<compile_context>
chip_gen: v7x
topology: tpu7x:2x2x1
jax: 0.10.0
libtpu: 0.0.40
codegen_flags: <defaults>
</compile_context>

<pallas_src>
import jax
import jax.numpy as jnp
from jax.experimental import pallas as pl
from jax.experimental.pallas import tpu as pltpu


def _round_up(x, m):
    return ((x + m - 1) // m) * m


_BUDGETS = None


def _hw_budgets():
    """(vmem_limit_bytes, tile_budget_bytes, tm_max) per TPU generation."""
    global _BUDGETS
    if _BUDGETS is None:
        try:
            cap = int(pltpu.get_tpu_info().vmem_capacity_bytes)
        except Exception:
            cap = 64 * 1024 * 1024          # conservative fallback (v7x-sized)
        if cap >= 120 * 1024 * 1024:        # v5e / v6e: 128 MiB per TensorCore
            _BUDGETS = (100 * 1024 * 1024, 64 * 1024 * 1024, 1024)
        elif cap >= 56 * 1024 * 1024:       # v7x: 64 MiB per TensorCore
            _BUDGETS = (40 * 1024 * 1024, 24 * 1024 * 1024, 512)
        else:                               # unknown / emulated
            _BUDGETS = (cap // 2, cap // 3, 256)
    return _BUDGETS


def _pick_tm(n, bytes_per_row, fixed_bytes=0):
    """Largest row tile (power-of-two steps, multiple of 8) whose working set
    (double-buffered streaming blocks + in-kernel temporaries, `bytes_per_row`
    per row, plus grid-invariant `fixed_bytes`) stays under the tile budget.
    Large problems are capped to >= ~4 grid steps (>= 2 pipelined steps per
    TensorCore under megacore sharding), but never below 128 rows."""
    _, tile_budget, tm_max = _hw_budgets()
    budget = max(tile_budget - fixed_bytes, 1 << 20)
    tm = tm_max
    while tm > 8 and tm * bytes_per_row > budget:
        tm //= 2
    step_cap = max(128, _round_up(-(-n // 4), 8))
    tm = min(tm, step_cap)
    if tm >= n:
        return n          # single full block: block dims == array dims, legal
    return max(tm, 8)


def _mosaic_params():
    limit, _, _ = _hw_budgets()
    return pltpu.CompilerParams(
        dimension_semantics=("parallel",),
        vmem_limit_bytes=limit,
    )


# -----------------------------------------------------------------------------
# K1: attention over adjacency kernels (agg Linear folded in host-side).
#   z4 = A0 @ W1' + A1 @ W2' + A2 @ W3' + b'   (W'_k are (N, 3))
#   nz = softmax(z4, axis=1)
# Row-tiled over node rows; matmuls take the (bf16) adjacency blocks directly,
# accumulate f32; softmax math stays f32, divide goes to the EUP.
# -----------------------------------------------------------------------------
def attention_kernel(a0_ref, a1_ref, a2_ref, w1_ref, w2_ref, w3_ref, b_ref,
                     nz_ref):
    z4 = (jnp.dot(a0_ref[...], w1_ref[...], preferred_element_type=jnp.float32)
          + jnp.dot(a1_ref[...], w2_ref[...], preferred_element_type=jnp.float32)
          + jnp.dot(a2_ref[...], w3_ref[...], preferred_element_type=jnp.float32)
          + b_ref[...])
    m = jnp.max(z4, axis=1, keepdims=True)
    e = jnp.exp(z4 - m)
    nz_ref[...] = e * pl.reciprocal(jnp.sum(e, axis=1, keepdims=True),
                                    approx=True)


def attention_nz(a0, a1, a2, w1p, w2p, w3p, bp):
    n = a0.shape[0]
    n_adj = w1p.shape[1]
    in_sz = jnp.dtype(a0.dtype).itemsize
    # per-row: 3 double-buffered A_k row blocks + tiny f32 z4/nz temporaries
    bytes_per_row = 2 * 3 * n * in_sz + 8 * n_adj * 4
    fixed = 2 * (3 * n * n_adj * in_sz + n_adj * 4)     # W'_k + bias blocks
    tm = _pick_tm(n, bytes_per_row, fixed)
    adj_spec = lambda: pl.BlockSpec((tm, n), lambda i: (i, 0))
    full = lambda shape: pl.BlockSpec(shape, lambda i: (0, 0))
    # The (N, 3) output store is a few KB total; the width-3 masked store is
    # negligible next to the (N, N) adjacency reads (transposed lane-dense
    # store skipped deliberately — see header note).
    return pl.pallas_call(
        attention_kernel,
        out_shape=jax.ShapeDtypeStruct((n, n_adj), jnp.float32),
        grid=(pl.cdiv(n, tm),),
        in_specs=[adj_spec(), adj_spec(), adj_spec(),
                  full((n, n_adj)), full((n, n_adj)), full((n, n_adj)),
                  full((1, n_adj))],
        out_specs=pl.BlockSpec((tm, n_adj), lambda i: (i, 0)),
        compiler_params=_mosaic_params(),
    )(a0, a1, a2, w1p, w2p, w3p, bp)


# -----------------------------------------------------------------------------
# K2: layer-1 feature transform  s1 = x @ W  (computed once, bf16 out, f32 acc)
# -----------------------------------------------------------------------------
def support_kernel(x_ref, w_ref, o_ref):
    o_ref[...] = jnp.dot(x_ref[...], w_ref[...],
                         preferred_element_type=jnp.float32).astype(o_ref.dtype)


def linear_support(x, w, out_dtype):
    n, fin = x.shape
    fout = w.shape[1]
    bytes_per_row = 2 * (fin * jnp.dtype(x.dtype).itemsize
                         + fout * jnp.dtype(out_dtype).itemsize)
    fixed = 2 * fin * fout * jnp.dtype(w.dtype).itemsize
    tm = _pick_tm(n, bytes_per_row, fixed)
    return pl.pallas_call(
        support_kernel,
        out_shape=jax.ShapeDtypeStruct((n, fout), out_dtype),
        grid=(pl.cdiv(n, tm),),
        in_specs=[pl.BlockSpec((tm, fin), lambda i: (i, 0)),
                  pl.BlockSpec((fin, fout), lambda i: (0, 0))],
        out_specs=pl.BlockSpec((tm, fout), lambda i: (i, 0)),
        compiler_params=_mosaic_params(),
    )(x, w)


# -----------------------------------------------------------------------------
# K3: fused combine + layer-1 aggregation + layer-2 feature transform.
#   adj_blk = nz[:,0]*A0 + nz[:,1]*A1 + nz[:,2]*A2   (per-COLUMN scaling: the
#             torch broadcast nz[:,k] * A_k; nz passed transposed as (3, N))
#   store adj_blk in bf16 (re-read by layers 2/3)
#   h   = relu(adj_blk_f32 @ s1 + b1)
#   s2  = h @ W_gcn           (next layer's support, stored instead of h)
# -----------------------------------------------------------------------------
def fused_combine_gcn1_kernel(nzT_ref, a0_ref, a1_ref, a2_ref, s1_ref, b1_ref,
                              wnext_ref, adj_ref, snext_ref):
    f32 = jnp.float32
    adj = (nzT_ref[0:1, :] * a0_ref[...].astype(f32)
           + nzT_ref[1:2, :] * a1_ref[...].astype(f32)
           + nzT_ref[2:3, :] * a2_ref[...].astype(f32))
    adj_ref[...] = adj.astype(adj_ref.dtype)
    # Layer-1 aggregation uses the f32 adj block already in VMEM (free).
    h = (jnp.dot(adj, s1_ref[...].astype(f32), preferred_element_type=f32)
         + b1_ref[...])
    h = jnp.maximum(h, 0.0)
    snext_ref[...] = jnp.dot(h.astype(wnext_ref.dtype), wnext_ref[...],
                             preferred_element_type=f32).astype(snext_ref.dtype)


def fused_combine_gcn1(nzT, a0, a1, a2, s1, b1, wnext, adj_dtype, snext_dtype):
    n = a0.shape[0]
    nhid = s1.shape[1]
    fnext = wnext.shape[1]
    in_sz = jnp.dtype(a0.dtype).itemsize
    bytes_per_row = (2 * 3 * n * in_sz                       # A_k inputs (x2 buf)
                     + 2 * n * jnp.dtype(adj_dtype).itemsize  # adj out (x2 buf)
                     + 2 * fnext * jnp.dtype(snext_dtype).itemsize
                     + 3 * n * 4                              # f32 combine temps
                     + 4 * nhid * 4)                          # f32 h temp
    fixed = 2 * (3 * n * 4
                 + s1.size * jnp.dtype(s1.dtype).itemsize
                 + wnext.size * jnp.dtype(wnext.dtype).itemsize
                 + b1.size * 4)
    tm = _pick_tm(n, bytes_per_row, fixed)
    row = lambda: pl.BlockSpec((tm, n), lambda i: (i, 0))
    full = lambda shape: pl.BlockSpec(shape, lambda i: (0, 0))
    return pl.pallas_call(
        fused_combine_gcn1_kernel,
        out_shape=(jax.ShapeDtypeStruct((n, n), adj_dtype),
                   jax.ShapeDtypeStruct((n, fnext), snext_dtype)),
        grid=(pl.cdiv(n, tm),),
        in_specs=[full((3, n)), row(), row(), row(),
                  full(s1.shape), full((1, b1.shape[-1])), full(wnext.shape)],
        out_specs=(pl.BlockSpec((tm, n), lambda i: (i, 0)),
                   pl.BlockSpec((tm, fnext), lambda i: (i, 0))),
        compiler_params=_mosaic_params(),
    )(nzT, a0, a1, a2, s1, b1, wnext)


# -----------------------------------------------------------------------------
# K4: fused middle-layer aggregation + next feature transform.
#   x_tilde = relu(adj @ s + b) ;  s_next = x_tilde @ W_next   (stored)
# -----------------------------------------------------------------------------
def fused_gcn_mid_kernel(adj_ref, s_ref, b_ref, wnext_ref, snext_ref):
    h = (jnp.dot(adj_ref[...], s_ref[...], preferred_element_type=jnp.float32)
         + b_ref[...])
    h = jnp.maximum(h, 0.0)
    snext_ref[...] = jnp.dot(h.astype(wnext_ref.dtype), wnext_ref[...],
                             preferred_element_type=jnp.float32
                             ).astype(snext_ref.dtype)


def fused_gcn_mid(adj, s, b, wnext, out_dtype):
    n = adj.shape[0]
    fmid = s.shape[1]
    fnext = wnext.shape[1]
    bytes_per_row = (2 * n * jnp.dtype(adj.dtype).itemsize
                     + 2 * fnext * jnp.dtype(out_dtype).itemsize
                     + 4 * fmid * 4)
    fixed = 2 * (s.size * jnp.dtype(s.dtype).itemsize
                 + wnext.size * jnp.dtype(wnext.dtype).itemsize + b.size * 4)
    tm = _pick_tm(n, bytes_per_row, fixed)
    full = lambda shape: pl.BlockSpec(shape, lambda i: (0, 0))
    return pl.pallas_call(
        fused_gcn_mid_kernel,
        out_shape=jax.ShapeDtypeStruct((n, fnext), out_dtype),
        grid=(pl.cdiv(n, tm),),
        in_specs=[pl.BlockSpec((tm, n), lambda i: (i, 0)),
                  full(s.shape), full((1, b.shape[-1])), full(wnext.shape)],
        out_specs=pl.BlockSpec((tm, fnext), lambda i: (i, 0)),
        compiler_params=_mosaic_params(),
    )(adj, s, b, wnext)


# -----------------------------------------------------------------------------
# K5: final aggregation with fused row softmax.  out = softmax(adj @ s + b)
# -----------------------------------------------------------------------------
def gcn_final_kernel(adj_ref, s_ref, b_ref, o_ref):
    z = (jnp.dot(adj_ref[...], s_ref[...], preferred_element_type=jnp.float32)
         + b_ref[...])
    m = jnp.max(z, axis=1, keepdims=True)
    e = jnp.exp(z - m)
    o_ref[...] = e * pl.reciprocal(jnp.sum(e, axis=1, keepdims=True),
                                   approx=True)


def gcn_final(adj, s, b):
    n = adj.shape[0]
    fout = s.shape[1]
    bytes_per_row = (2 * n * jnp.dtype(adj.dtype).itemsize
                     + 2 * fout * 4 + 4 * fout * 4)
    fixed = 2 * (s.size * jnp.dtype(s.dtype).itemsize + b.size * 4)
    tm = _pick_tm(n, bytes_per_row, fixed)
    full = lambda shape: pl.BlockSpec(shape, lambda i: (0, 0))
    return pl.pallas_call(
        gcn_final_kernel,
        out_shape=jax.ShapeDtypeStruct((n, fout), jnp.float32),
        grid=(pl.cdiv(n, tm),),
        in_specs=[pl.BlockSpec((tm, n), lambda i: (i, 0)),
                  full(s.shape), full((1, b.shape[-1]))],
        out_specs=pl.BlockSpec((tm, fout), lambda i: (i, 0)),
        compiler_params=_mosaic_params(),
    )(adj, s, b)


# -----------------------------------------------------------------------------
# Full forward (matches GCN_attention_v3.forward).
# -----------------------------------------------------------------------------
def gcn_attention_v3_forward(params, adj_list, x, *, compute_dtype=jnp.bfloat16):
    a0, a1, a2 = adj_list
    adj_in_dtype = a0.dtype

    # Fold the agg Linear into the three attention Linears (host-side, tiny):
    #   z4 = cat(z1,z2,z3) @ Wagg + bagg
    #      = A0 @ (W1@Wagg1) + A1 @ (W2@Wagg2) + A2 @ (W3@Wagg3)
    #        + (b1@Wagg1 + b2@Wagg2 + b3@Wagg3 + bagg)
    wagg = params["agg_w"]
    wagg1, wagg2, wagg3 = wagg[0:30], wagg[30:60], wagg[60:90]
    w1p = (params["atten_w"] @ wagg1).astype(adj_in_dtype)
    w2p = (params["atten2_w"] @ wagg2).astype(adj_in_dtype)
    w3p = (params["atten3_w"] @ wagg3).astype(adj_in_dtype)
    bp = (params["atten_b"] @ wagg1 + params["atten2_b"] @ wagg2
          + params["atten3_b"] @ wagg3 + params["agg_b"])

    nz = attention_nz(a0, a1, a2, w1p, w2p, w3p, bp)       # (N, 3) f32
    nzT = nz.T                                             # tiny glue transpose

    # Layer-1 support (the layer-2/3 supports are fused into the epilogues).
    s1 = linear_support(x.astype(compute_dtype),
                        params["gcn1_w"].astype(compute_dtype), compute_dtype)

    # Fused combine + layer-1 aggregation (+ReLU) + layer-2 feature transform.
    # adj materialized once in bf16 for layers 2/3.
    adj, s2 = fused_combine_gcn1(
        nzT, a0, a1, a2, s1, params["gcn1_b"],
        params["gcn_w"].astype(compute_dtype),
        adj_dtype=compute_dtype, snext_dtype=compute_dtype)
    # TODO(synk): the reference converts adj.to_sparse(); that is a storage
    # format change only — dense adjacency is used here with identical numerics.

    # Fused layer-2 aggregation (+ReLU) + layer-3 feature transform.
    s3 = fused_gcn_mid(adj, s2, params["gcn_b"],
                       params["gcn2_w"].astype(compute_dtype), compute_dtype)

    # Layer-3 aggregation with fused row softmax; f32 output.
    out = gcn_final(adj, s3, params["gcn2_b"])

    nj = nz  # nj = softmax(z4, dim=1) == nz
    return out, nj


# -----------------------------------------------------------------------------
# Deterministic parameter init (torch.nn.Linear-style uniform init shapes).
# Q/K/V/LayerNorm/memory_unit/dropout exist in the torch __init__ but are dead
# in forward(), so they are not materialized here.
# -----------------------------------------------------------------------------
def init_params(key, n_nodes, nfeat, nhid, nclass):
    ks = jax.random.split(key, 8)

    def lin(k, fan_in, fan_out):
        kw, kb = jax.random.split(k)
        bound = 1.0 / (fan_in ** 0.5)
        w = jax.random.uniform(kw, (fan_in, fan_out), jnp.float32, -bound, bound)
        b = jax.random.uniform(kb, (1, fan_out), jnp.float32, -bound, bound)
        return w, b

    p = {}
    p["atten_w"], p["atten_b"] = lin(ks[0], n_nodes, 30)
    p["atten2_w"], p["atten2_b"] = lin(ks[1], n_nodes, 30)
    # TODO(synk): reference __init__ never defines self.atten3 and sizes
    # self.agg as Linear(60, 3), but forward() requires atten3 and a 90-wide
    # agg input — forward-consistent shapes are used here.
    p["atten3_w"], p["atten3_b"] = lin(ks[2], n_nodes, 30)
    p["agg_w"], p["agg_b"] = lin(ks[3], 90, 3)
    p["gcn1_w"], p["gcn1_b"] = lin(ks[4], nfeat, nhid)
    p["gcn_w"], p["gcn_b"] = lin(ks[5], nhid, nhid)
    p["gcn2_w"], p["gcn2_b"] = lin(ks[6], nhid, nclass)
    return p


# -----------------------------------------------------------------------------
# Pure-JAX f32 reference (unfolded, un-fused) for a numerical sanity check.
# -----------------------------------------------------------------------------
def reference_forward(params, adj_list, x):
    a0, a1, a2 = adj_list
    z1 = a0 @ params["atten_w"] + params["atten_b"]
    z2 = a1 @ params["atten2_w"] + params["atten2_b"]
    z3 = a2 @ params["atten3_w"] + params["atten3_b"]
    z4 = jnp.concatenate([z1, z2, z3], axis=1) @ params["agg_w"] + params["agg_b"]
    nz = jax.nn.softmax(z4, axis=1)
    adj = nz[:, 0] * a0 + nz[:, 1] * a1 + nz[:, 2] * a2
    h = jax.nn.relu(adj @ (x @ params["gcn1_w"]) + params["gcn1_b"])
    x_tilde = jax.nn.relu(adj @ (h @ params["gcn_w"]) + params["gcn_b"])
    z = adj @ (x_tilde @ params["gcn2_w"]) + params["gcn2_b"]
    return jax.nn.softmax(z, axis=1), jax.nn.softmax(z4, axis=1)


if __name__ == "__main__":
    key = jax.random.PRNGKey(0)
    n_nodes, nfeat, nhid, nclass = 128, 32, 32, 8

    k0, k1, k2, k3, kp = jax.random.split(key, 5)
    # Normalized-adjacency-like magnitudes (row sums ~1), as a GCN would use.
    adj_f32 = [jax.random.uniform(k, (n_nodes, n_nodes), jnp.float32)
               * (2.0 / n_nodes) for k in (k0, k1, k2)]
    x = jax.random.normal(k3, (n_nodes, nfeat), jnp.float32)
    params = init_params(kp, n_nodes, nfeat, nhid, nclass)

    # Per the perf review: adjacency inputs are stored/read in bf16 (the
    # attention + fused-combine passes are HBM-BW bound on 3x(N,N) reads);
    # the one-time cast happens outside the forward and is amortized.
    adj_bf16 = [a.astype(jnp.bfloat16) for a in adj_f32]

    forward = jax.jit(gcn_attention_v3_forward)
    out, nj = forward(params, adj_bf16, x)
    out = jax.block_until_ready(out)
    nj = jax.block_until_ready(nj)

    ref_out, ref_nj = reference_forward(params, adj_f32, x)
    assert out.shape == (n_nodes, nclass) and nj.shape == (n_nodes, 3)
    assert bool(jnp.all(jnp.isfinite(out))) and bool(jnp.all(jnp.isfinite(nj)))
    # Tolerances account for bf16 adjacency inputs / bf16 adj & supports
    # (f32 MXU accumulation) and the approx-reciprocal softmax denominators.
    assert jnp.allclose(nj, ref_nj, rtol=2e-2, atol=2e-3), \
        float(jnp.max(jnp.abs(nj - ref_nj)))
    assert jnp.allclose(out, ref_out, rtol=5e-2, atol=5e-3), \
        float(jnp.max(jnp.abs(out - ref_out)))

    print("KERNEL_OK")
</pallas_src>

<mosaic_0001>
module attributes {stable_mosaic.version = 11 : i64} {
  func.func @attention_kernel(%arg0: i32, %arg1: memref<128x128xbf16, #tpu.memory_space<vmem>>, %arg2: memref<128x128xbf16, #tpu.memory_space<vmem>>, %arg3: memref<128x128xbf16, #tpu.memory_space<vmem>>, %arg4: memref<128x3xbf16, #tpu.memory_space<vmem>>, %arg5: memref<128x3xbf16, #tpu.memory_space<vmem>>, %arg6: memref<128x3xbf16, #tpu.memory_space<vmem>>, %arg7: memref<1x3xf32, #tpu.memory_space<vmem>>, %arg8: memref<128x3xf32, #tpu.memory_space<vmem>>) attributes {dimension_semantics = [#tpu.dimension_semantics<parallel>], iteration_bounds = array<i64: 1>, scalar_prefetch = 0 : i64, scratch_operands = 0 : i64, tpu.core_type = #tpu.core_type<tc>, window_params = [{transform_indices = @transform_0, window_bounds = array<i64: 128, 128>}, {transform_indices = @transform_1, window_bounds = array<i64: 128, 128>}, {transform_indices = @transform_2, window_bounds = array<i64: 128, 128>}, {pipeline_mode = #tpu.pipeline_mode<synchronous>, transform_indices = @transform_3, window_bounds = array<i64: 128, 3>}, {pipeline_mode = #tpu.pipeline_mode<synchronous>, transform_indices = @transform_4, window_bounds = array<i64: 128, 3>}, {pipeline_mode = #tpu.pipeline_mode<synchronous>, transform_indices = @transform_5, window_bounds = array<i64: 128, 3>}, {pipeline_mode = #tpu.pipeline_mode<synchronous>, transform_indices = @transform_6, window_bounds = array<i64: 1, 3>}, {transform_indices = @transform_7, window_bounds = array<i64: 128, 3>}]} {
    %c0 = arith.constant 0 : index
    %c0_0 = arith.constant 0 : index
    %0 = vector.load %arg1[%c0, %c0_0] : memref<128x128xbf16, #tpu.memory_space<vmem>>, vector<128x128xbf16>
    %c0_1 = arith.constant 0 : index
    %c0_2 = arith.constant 0 : index
    %1 = vector.load %arg4[%c0_1, %c0_2] : memref<128x3xbf16, #tpu.memory_space<vmem>>, vector<128x3xbf16>
    %cst = arith.constant dense<0.000000e+00> : vector<128x3xf32>
    %2 = tpu.matmul %0, %1, %cst {dimension_numbers = #tpu.dot_dimension_numbers<[1], [0], [0], [1], [0, 0, 1, 1], [], []>} : vector<128x128xbf16>, vector<128x3xbf16>, vector<128x3xf32> -> vector<128x3xf32>
    %c0_3 = arith.constant 0 : index
    %c0_4 = arith.constant 0 : index
    %3 = vector.load %arg2[%c0_3, %c0_4] : memref<128x128xbf16, #tpu.memory_space<vmem>>, vector<128x128xbf16>
    %c0_5 = arith.constant 0 : index
    %c0_6 = arith.constant 0 : index
    %4 = vector.load %arg5[%c0_5, %c0_6] : memref<128x3xbf16, #tpu.memory_space<vmem>>, vector<128x3xbf16>
    %cst_7 = arith.constant dense<0.000000e+00> : vector<128x3xf32>
    %5 = tpu.matmul %3, %4, %cst_7 {dimension_numbers = #tpu.dot_dimension_numbers<[1], [0], [0], [1], [0, 0, 1, 1], [], []>} : vector<128x128xbf16>, vector<128x3xbf16>, vector<128x3xf32> -> vector<128x3xf32>
    %6 = arith.addf %2, %5 : vector<128x3xf32>
    %c0_8 = arith.constant 0 : index
    %c0_9 = arith.constant 0 : index
    %7 = vector.load %arg3[%c0_8, %c0_9] : memref<128x128xbf16, #tpu.memory_space<vmem>>, vector<128x128xbf16>
    %c0_10 = arith.constant 0 : index
    %c0_11 = arith.constant 0 : index
    %8 = vector.load %arg6[%c0_10, %c0_11] : memref<128x3xbf16, #tpu.memory_space<vmem>>, vector<128x3xbf16>
    %cst_12 = arith.constant dense<0.000000e+00> : vector<128x3xf32>
    %9 = tpu.matmul %7, %8, %cst_12 {dimension_numbers = #tpu.dot_dimension_numbers<[1], [0], [0], [1], [0, 0, 1, 1], [], []>} : vector<128x128xbf16>, vector<128x3xbf16>, vector<128x3xf32> -> vector<128x3xf32>
    %10 = arith.addf %6, %9 : vector<128x3xf32>
    %c0_13 = arith.constant 0 : index
    %c0_14 = arith.constant 0 : index
    %11 = vector.load %arg7[%c0_13, %c0_14] : memref<1x3xf32, #tpu.memory_space<vmem>>, vector<1x3xf32>
    %12 = vector.broadcast %11 : vector<1x3xf32> to vector<128x3xf32>
    %13 = arith.addf %10, %12 : vector<128x3xf32>
    %cst_15 = arith.constant dense<0xFF800000> : vector<128xf32>
    %14 = vector.multi_reduction <maximumf>, %13, %cst_15 [1] : vector<128x3xf32> to vector<128xf32>
    %15 = vector.shape_cast %14 : vector<128xf32> to vector<128x1xf32>
    %16 = vector.broadcast %15 : vector<128x1xf32> to vector<128x3xf32>
    %17 = arith.subf %13, %16 : vector<128x3xf32>
    %18 = math.exp %17 : vector<128x3xf32>
    %cst_16 = arith.constant dense<0.000000e+00> : vector<128xf32>
    %19 = vector.multi_reduction <add>, %18, %cst_16 [1] : vector<128x3xf32> to vector<128xf32>
    %20 = vector.shape_cast %19 : vector<128xf32> to vector<128x1xf32>
    %21 = tpu.reciprocal %20 {approx = true} : vector<128x1xf32> -> vector<128x1xf32>
    %22 = vector.broadcast %21 : vector<128x1xf32> to vector<128x3xf32>
    %23 = arith.mulf %18, %22 : vector<128x3xf32>
    %c0_17 = arith.constant 0 : index
    %c0_18 = arith.constant 0 : index
    %24 = vector.load %arg8[%c0_17, %c0_18] : memref<128x3xf32, #tpu.memory_space<vmem>>, vector<128x3xf32>
    tpu.vector_store %arg8[%c0_17, %c0_18], %23 {strides = array<i32>} : memref<128x3xf32, #tpu.memory_space<vmem>>, vector<128x3xf32>,
    return
  }
  func.func @transform_0(%arg0: i32) -> (i32, i32) {
    %c0_i32 = arith.constant 0 : i32
    %c0_i32_0 = arith.constant 0 : i32
    return %arg0, %c0_i32 : i32, i32
  }
  func.func @transform_1(%arg0: i32) -> (i32, i32) {
    %c0_i32 = arith.constant 0 : i32
    %c0_i32_0 = arith.constant 0 : i32
    return %arg0, %c0_i32 : i32, i32
  }
  func.func @transform_2(%arg0: i32) -> (i32, i32) {
    %c0_i32 = arith.constant 0 : i32
    %c0_i32_0 = arith.constant 0 : i32
    return %arg0, %c0_i32 : i32, i32
  }
  func.func @transform_3(%arg0: i32) -> (i32, i32) {
    %c0_i32 = arith.constant 0 : i32
    %c0_i32_0 = arith.constant 0 : i32
    %c0_i32_1 = arith.constant 0 : i32
    return %c0_i32, %c0_i32_0 : i32, i32
  }
  func.func @transform_4(%arg0: i32) -> (i32, i32) {
    %c0_i32 = arith.constant 0 : i32
    %c0_i32_0 = arith.constant 0 : i32
    %c0_i32_1 = arith.constant 0 : i32
    return %c0_i32, %c0_i32_0 : i32, i32
  }
  func.func @transform_5(%arg0: i32) -> (i32, i32) {
    %c0_i32 = arith.constant 0 : i32
    %c0_i32_0 = arith.constant 0 : i32
    %c0_i32_1 = arith.constant 0 : i32
    return %c0_i32, %c0_i32_0 : i32, i32
  }
  func.func @transform_6(%arg0: i32) -> (i32, i32) {
    %c0_i32 = arith.constant 0 : i32
    %c0_i32_0 = arith.constant 0 : i32
    %c0_i32_1 = arith.constant 0 : i32
    return %c0_i32, %c0_i32_0 : i32, i32
  }
  func.func @transform_7(%arg0: i32) -> (i32, i32) {
    %c0_i32 = arith.constant 0 : i32
    %c0_i32_0 = arith.constant 0 : i32
    return %arg0, %c0_i32 : i32, i32
  }
}

module attributes {stable_mosaic.version = 11 : i64} {
  func.func @support_kernel(%arg0: i32, %arg1: memref<128x32xbf16, #tpu.memory_space<vmem>>, %arg2: memref<32x32xbf16, #tpu.memory_space<vmem>>, %arg3: memref<128x32xbf16, #tpu.memory_space<vmem>>) attributes {dimension_semantics = [#tpu.dimension_semantics<parallel>], iteration_bounds = array<i64: 1>, scalar_prefetch = 0 : i64, scratch_operands = 0 : i64, tpu.core_type = #tpu.core_type<tc>, window_params = [{transform_indices = @transform_0, window_bounds = array<i64: 128, 32>}, {pipeline_mode = #tpu.pipeline_mode<synchronous>, transform_indices = @transform_1, window_bounds = array<i64: 32, 32>}, {transform_indices = @transform_2, window_bounds = array<i64: 128, 32>}]} {
    %c0 = arith.constant 0 : index
    %c0_0 = arith.constant 0 : index
    %0 = vector.load %arg1[%c0, %c0_0] : memref<128x32xbf16, #tpu.memory_space<vmem>>, vector<128x32xbf16>
    %c0_1 = arith.constant 0 : index
    %c0_2 = arith.constant 0 : index
    %1 = vector.load %arg2[%c0_1, %c0_2] : memref<32x32xbf16, #tpu.memory_space<vmem>>, vector<32x32xbf16>
    %cst = arith.constant dense<0.000000e+00> : vector<128x32xf32>
    %2 = tpu.matmul %0, %1, %cst {dimension_numbers = #tpu.dot_dimension_numbers<[1], [0], [0], [1], [0, 0, 1, 1], [], []>} : vector<128x32xbf16>, vector<32x32xbf16>, vector<128x32xf32> -> vector<128x32xf32>
    %3 = arith.truncf %2 : vector<128x32xf32> to vector<128x32xbf16>
    %c0_3 = arith.constant 0 : index
    %c0_4 = arith.constant 0 : index
    %4 = vector.load %arg3[%c0_3, %c0_4] : memref<128x32xbf16, #tpu.memory_space<vmem>>, vector<128x32xbf16>
    tpu.vector_store %arg3[%c0_3, %c0_4], %3 {strides = array<i32>} : memref<128x32xbf16, #tpu.memory_space<vmem>>, vector<128x32xbf16>,
    return
  }
  func.func @transform_0(%arg0: i32) -> (i32, i32) {
    %c0_i32 = arith.constant 0 : i32
    %c0_i32_0 = arith.constant 0 : i32
    return %arg0, %c0_i32 : i32, i32
  }
  func.func @transform_1(%arg0: i32) -> (i32, i32) {
    %c0_i32 = arith.constant 0 : i32
    %c0_i32_0 = arith.constant 0 : i32
    %c0_i32_1 = arith.constant 0 : i32
    return %c0_i32, %c0_i32_0 : i32, i32
  }
  func.func @transform_2(%arg0: i32) -> (i32, i32) {
    %c0_i32 = arith.constant 0 : i32
    %c0_i32_0 = arith.constant 0 : i32
    return %arg0, %c0_i32 : i32, i32
  }
}

module attributes {stable_mosaic.version = 11 : i64} {
  func.func @fused_combine_gcn1_kernel(%arg0: i32, %arg1: memref<3x128xf32, #tpu.memory_space<vmem>>, %arg2: memref<128x128xbf16, #tpu.memory_space<vmem>>, %arg3: memref<128x128xbf16, #tpu.memory_space<vmem>>, %arg4: memref<128x128xbf16, #tpu.memory_space<vmem>>, %arg5: memref<128x32xbf16, #tpu.memory_space<vmem>>, %arg6: memref<1x32xf32, #tpu.memory_space<vmem>>, %arg7: memref<32x32xbf16, #tpu.memory_space<vmem>>, %arg8: memref<128x128xbf16, #tpu.memory_space<vmem>>, %arg9: memref<128x32xbf16, #tpu.memory_space<vmem>>) attributes {dimension_semantics = [#tpu.dimension_semantics<parallel>], iteration_bounds = array<i64: 1>, scalar_prefetch = 0 : i64, scratch_operands = 0 : i64, tpu.core_type = #tpu.core_type<tc>, window_params = [{pipeline_mode = #tpu.pipeline_mode<synchronous>, transform_indices = @transform_0, window_bounds = array<i64: 3, 128>}, {transform_indices = @transform_1, window_bounds = array<i64: 128, 128>}, {transform_indices = @transform_2, window_bounds = array<i64: 128, 128>}, {transform_indices = @transform_3, window_bounds = array<i64: 128, 128>}, {pipeline_mode = #tpu.pipeline_mode<synchronous>, transform_indices = @transform_4, window_bounds = array<i64: 128, 32>}, {pipeline_mode = #tpu.pipeline_mode<synchronous>, transform_indices = @transform_5, window_bounds = array<i64: 1, 32>}, {pipeline_mode = #tpu.pipeline_mode<synchronous>, transform_indices = @transform_6, window_bounds = array<i64: 32, 32>}, {transform_indices = @transform_7, window_bounds = array<i64: 128, 128>}, {transform_indices = @transform_8, window_bounds = array<i64: 128, 32>}]} {
    %c0 = arith.constant 0 : index
    %c0_0 = arith.constant 0 : index
    %0 = vector.load %arg1[%c0, %c0_0] : memref<3x128xf32, #tpu.memory_space<vmem>>, vector<1x128xf32>
    %c0_1 = arith.constant 0 : index
    %c0_2 = arith.constant 0 : index
    %1 = vector.load %arg2[%c0_1, %c0_2] : memref<128x128xbf16, #tpu.memory_space<vmem>>, vector<128x128xbf16>
    %2 = arith.extf %1 : vector<128x128xbf16> to vector<128x128xf32>
    %3 = vector.broadcast %0 : vector<1x128xf32> to vector<128x128xf32>
    %4 = arith.mulf %3, %2 : vector<128x128xf32>
    %c1 = arith.constant 1 : index
    %c0_3 = arith.constant 0 : index
    %5 = vector.load %arg1[%c1, %c0_3] : memref<3x128xf32, #tpu.memory_space<vmem>>, vector<1x128xf32>
    %c0_4 = arith.constant 0 : index
    %c0_5 = arith.constant 0 : index
    %6 = vector.load %arg3[%c0_4, %c0_5] : memref<128x128xbf16, #tpu.memory_space<vmem>>, vector<128x128xbf16>
    %7 = arith.extf %6 : vector<128x128xbf16> to vector<128x128xf32>
    %8 = vector.broadcast %5 : vector<1x128xf32> to vector<128x128xf32>
    %9 = arith.mulf %8, %7 : vector<128x128xf32>
    %10 = arith.addf %4, %9 : vector<128x128xf32>
    %c2 = arith.constant 2 : index
    %c0_6 = arith.constant 0 : index
    %11 = vector.load %arg1[%c2, %c0_6] : memref<3x128xf32, #tpu.memory_space<vmem>>, vector<1x128xf32>
    %c0_7 = arith.constant 0 : index
    %c0_8 = arith.constant 0 : index
    %12 = vector.load %arg4[%c0_7, %c0_8] : memref<128x128xbf16, #tpu.memory_space<vmem>>, vector<128x128xbf16>
    %13 = arith.extf %12 : vector<128x128xbf16> to vector<128x128xf32>
    %14 = vector.broadcast %11 : vector<1x128xf32> to vector<128x128xf32>
    %15 = arith.mulf %14, %13 : vector<128x128xf32>
    %16 = arith.addf %10, %15 : vector<128x128xf32>
    %17 = arith.truncf %16 : vector<128x128xf32> to vector<128x128xbf16>
    %c0_9 = arith.constant 0 : index
    %c0_10 = arith.constant 0 : index
    %18 = vector.load %arg8[%c0_9, %c0_10] : memref<128x128xbf16, #tpu.memory_space<vmem>>, vector<128x128xbf16>
    tpu.vector_store %arg8[%c0_9, %c0_10], %17 {strides = array<i32>} : memref<128x128xbf16, #tpu.memory_space<vmem>>, vector<128x128xbf16>,
    %c0_11 = arith.constant 0 : index
    %c0_12 = arith.constant 0 : index
    %19 = vector.load %arg5[%c0_11, %c0_12] : memref<128x32xbf16, #tpu.memory_space<vmem>>, vector<128x32xbf16>
    %20 = arith.extf %19 : vector<128x32xbf16> to vector<128x32xf32>
    %cst = arith.constant dense<0.000000e+00> : vector<128x32xf32>
    %21 = tpu.matmul %16, %20, %cst {dimension_numbers = #tpu.dot_dimension_numbers<[1], [0], [0], [1], [0, 0, 1, 1], [], []>} : vector<128x128xf32>, vector<128x32xf32>, vector<128x32xf32> -> vector<128x32xf32>
    %c0_13 = arith.constant 0 : index
    %c0_14 = arith.constant 0 : index
    %22 = vector.load %arg6[%c0_13, %c0_14] : memref<1x32xf32, #tpu.memory_space<vmem>>, vector<1x32xf32>
    %23 = vector.broadcast %22 : vector<1x32xf32> to vector<128x32xf32>
    %24 = arith.addf %21, %23 : vector<128x32xf32>
    %cst_15 = arith.constant 0.000000e+00 : f32
    %25 = vector.broadcast %cst_15 : f32 to vector<128x32xf32>
    %26 = arith.maximumf %24, %25 : vector<128x32xf32>
    %27 = arith.truncf %26 : vector<128x32xf32> to vector<128x32xbf16>
    %c0_16 = arith.constant 0 : index
    %c0_17 = arith.constant 0 : index
    %28 = vector.load %arg7[%c0_16, %c0_17] : memref<32x32xbf16, #tpu.memory_space<vmem>>, vector<32x32xbf16>
    %cst_18 = arith.constant dense<0.000000e+00> : vector<128x32xf32>
    %29 = tpu.matmul %27, %28, %cst_18 {dimension_numbers = #tpu.dot_dimension_numbers<[1], [0], [0], [1], [0, 0, 1, 1], [], []>} : vector<128x32xbf16>, vector<32x32xbf16>, vector<128x32xf32> -> vector<128x32xf32>
    %30 = arith.truncf %29 : vector<128x32xf32> to vector<128x32xbf16>
    %c0_19 = arith.constant 0 : index
    %c0_20 = arith.constant 0 : index
    %31 = vector.load %arg9[%c0_19, %c0_20] : memref<128x32xbf16, #tpu.memory_space<vmem>>, vector<128x32xbf16>
    tpu.vector_store %arg9[%c0_19, %c0_20], %30 {strides = array<i32>} : memref<128x32xbf16, #tpu.memory_space<vmem>>, vector<128x32xbf16>,
    return
  }
  func.func @transform_0(%arg0: i32) -> (i32, i32) {
    %c0_i32 = arith.constant 0 : i32
    %c0_i32_0 = arith.constant 0 : i32
    %c0_i32_1 = arith.constant 0 : i32
    return %c0_i32, %c0_i32_0 : i32, i32
  }
  func.func @transform_1(%arg0: i32) -> (i32, i32) {
    %c0_i32 = arith.constant 0 : i32
    %c0_i32_0 = arith.constant 0 : i32
    return %arg0, %c0_i32 : i32, i32
  }
  func.func @transform_2(%arg0: i32) -> (i32, i32) {
    %c0_i32 = arith.constant 0 : i32
    %c0_i32_0 = arith.constant 0 : i32
    return %arg0, %c0_i32 : i32, i32
  }
  func.func @transform_3(%arg0: i32) -> (i32, i32) {
    %c0_i32 = arith.constant 0 : i32
    %c0_i32_0 = arith.constant 0 : i32
    return %arg0, %c0_i32 : i32, i32
  }
  func.func @transform_4(%arg0: i32) -> (i32, i32) {
    %c0_i32 = arith.constant 0 : i32
    %c0_i32_0 = arith.constant 0 : i32
    %c0_i32_1 = arith.constant 0 : i32
    return %c0_i32, %c0_i32_0 : i32, i32
  }
  func.func @transform_5(%arg0: i32) -> (i32, i32) {
    %c0_i32 = arith.constant 0 : i32
    %c0_i32_0 = arith.constant 0 : i32
    %c0_i32_1 = arith.constant 0 : i32
    return %c0_i32, %c0_i32_0 : i32, i32
  }
  func.func @transform_6(%arg0: i32) -> (i32, i32) {
    %c0_i32 = arith.constant 0 : i32
    %c0_i32_0 = arith.constant 0 : i32
    %c0_i32_1 = arith.constant 0 : i32
    return %c0_i32, %c0_i32_0 : i32, i32
  }
  func.func @transform_7(%arg0: i32) -> (i32, i32) {
    %c0_i32 = arith.constant 0 : i32
    %c0_i32_0 = arith.constant 0 : i32
    return %arg0, %c0_i32 : i32, i32
  }
  func.func @transform_8(%arg0: i32) -> (i32, i32) {
    %c0_i32 = arith.constant 0 : i32
    %c0_i32_0 = arith.constant 0 : i32
    return %arg0, %c0_i32 : i32, i32
  }
}

module attributes {stable_mosaic.version = 11 : i64} {
  func.func @fused_gcn_mid_kernel(%arg0: i32, %arg1: memref<128x128xbf16, #tpu.memory_space<vmem>>, %arg2: memref<128x32xbf16, #tpu.memory_space<vmem>>, %arg3: memref<1x32xf32, #tpu.memory_space<vmem>>, %arg4: memref<32x8xbf16, #tpu.memory_space<vmem>>, %arg5: memref<128x8xbf16, #tpu.memory_space<vmem>>) attributes {dimension_semantics = [#tpu.dimension_semantics<parallel>], iteration_bounds = array<i64: 1>, scalar_prefetch = 0 : i64, scratch_operands = 0 : i64, tpu.core_type = #tpu.core_type<tc>, window_params = [{transform_indices = @transform_0, window_bounds = array<i64: 128, 128>}, {pipeline_mode = #tpu.pipeline_mode<synchronous>, transform_indices = @transform_1, window_bounds = array<i64: 128, 32>}, {pipeline_mode = #tpu.pipeline_mode<synchronous>, transform_indices = @transform_2, window_bounds = array<i64: 1, 32>}, {pipeline_mode = #tpu.pipeline_mode<synchronous>, transform_indices = @transform_3, window_bounds = array<i64: 32, 8>}, {transform_indices = @transform_4, window_bounds = array<i64: 128, 8>}]} {
    %c0 = arith.constant 0 : index
    %c0_0 = arith.constant 0 : index
    %0 = vector.load %arg1[%c0, %c0_0] : memref<128x128xbf16, #tpu.memory_space<vmem>>, vector<128x128xbf16>
    %c0_1 = arith.constant 0 : index
    %c0_2 = arith.constant 0 : index
    %1 = vector.load %arg2[%c0_1, %c0_2] : memref<128x32xbf16, #tpu.memory_space<vmem>>, vector<128x32xbf16>
    %cst = arith.constant dense<0.000000e+00> : vector<128x32xf32>
    %2 = tpu.matmul %0, %1, %cst {dimension_numbers = #tpu.dot_dimension_numbers<[1], [0], [0], [1], [0, 0, 1, 1], [], []>} : vector<128x128xbf16>, vector<128x32xbf16>, vector<128x32xf32> -> vector<128x32xf32>
    %c0_3 = arith.constant 0 : index
    %c0_4 = arith.constant 0 : index
    %3 = vector.load %arg3[%c0_3, %c0_4] : memref<1x32xf32, #tpu.memory_space<vmem>>, vector<1x32xf32>
    %4 = vector.broadcast %3 : vector<1x32xf32> to vector<128x32xf32>
    %5 = arith.addf %2, %4 : vector<128x32xf32>
    %cst_5 = arith.constant 0.000000e+00 : f32
    %6 = vector.broadcast %cst_5 : f32 to vector<128x32xf32>
    %7 = arith.maximumf %5, %6 : vector<128x32xf32>
    %8 = arith.truncf %7 : vector<128x32xf32> to vector<128x32xbf16>
    %c0_6 = arith.constant 0 : index
    %c0_7 = arith.constant 0 : index
    %9 = vector.load %arg4[%c0_6, %c0_7] : memref<32x8xbf16, #tpu.memory_space<vmem>>, vector<32x8xbf16>
    %cst_8 = arith.constant dense<0.000000e+00> : vector<128x8xf32>
    %10 = tpu.matmul %8, %9, %cst_8 {dimension_numbers = #tpu.dot_dimension_numbers<[1], [0], [0], [1], [0, 0, 1, 1], [], []>} : vector<128x32xbf16>, vector<32x8xbf16>, vector<128x8xf32> -> vector<128x8xf32>
    %11 = arith.truncf %10 : vector<128x8xf32> to vector<128x8xbf16>
    %c0_9 = arith.constant 0 : index
    %c0_10 = arith.constant 0 : index
    %12 = vector.load %arg5[%c0_9, %c0_10] : memref<128x8xbf16, #tpu.memory_space<vmem>>, vector<128x8xbf16>
    tpu.vector_store %arg5[%c0_9, %c0_10], %11 {strides = array<i32>} : memref<128x8xbf16, #tpu.memory_space<vmem>>, vector<128x8xbf16>,
    return
  }
  func.func @transform_0(%arg0: i32) -> (i32, i32) {
    %c0_i32 = arith.constant 0 : i32
    %c0_i32_0 = arith.constant 0 : i32
    return %arg0, %c0_i32 : i32, i32
  }
  func.func @transform_1(%arg0: i32) -> (i32, i32) {
    %c0_i32 = arith.constant 0 : i32
    %c0_i32_0 = arith.constant 0 : i32
    %c0_i32_1 = arith.constant 0 : i32
    return %c0_i32, %c0_i32_0 : i32, i32
  }
  func.func @transform_2(%arg0: i32) -> (i32, i32) {
    %c0_i32 = arith.constant 0 : i32
    %c0_i32_0 = arith.constant 0 : i32
    %c0_i32_1 = arith.constant 0 : i32
    return %c0_i32, %c0_i32_0 : i32, i32
  }
  func.func @transform_3(%arg0: i32) -> (i32, i32) {
    %c0_i32 = arith.constant 0 : i32
    %c0_i32_0 = arith.constant 0 : i32
    %c0_i32_1 = arith.constant 0 : i32
    return %c0_i32, %c0_i32_0 : i32, i32
  }
  func.func @transform_4(%arg0: i32) -> (i32, i32) {
    %c0_i32 = arith.constant 0 : i32
    %c0_i32_0 = arith.constant 0 : i32
    return %arg0, %c0_i32 : i32, i32
  }
}

module attributes {stable_mosaic.version = 11 : i64} {
  func.func @gcn_final_kernel(%arg0: i32, %arg1: memref<128x128xbf16, #tpu.memory_space<vmem>>, %arg2: memref<128x8xbf16, #tpu.memory_space<vmem>>, %arg3: memref<1x8xf32, #tpu.memory_space<vmem>>, %arg4: memref<128x8xf32, #tpu.memory_space<vmem>>) attributes {dimension_semantics = [#tpu.dimension_semantics<parallel>], iteration_bounds = array<i64: 1>, scalar_prefetch = 0 : i64, scratch_operands = 0 : i64, tpu.core_type = #tpu.core_type<tc>, window_params = [{transform_indices = @transform_0, window_bounds = array<i64: 128, 128>}, {pipeline_mode = #tpu.pipeline_mode<synchronous>, transform_indices = @transform_1, window_bounds = array<i64: 128, 8>}, {pipeline_mode = #tpu.pipeline_mode<synchronous>, transform_indices = @transform_2, window_bounds = array<i64: 1, 8>}, {transform_indices = @transform_3, window_bounds = array<i64: 128, 8>}]} {
    %c0 = arith.constant 0 : index
    %c0_0 = arith.constant 0 : index
    %0 = vector.load %arg1[%c0, %c0_0] : memref<128x128xbf16, #tpu.memory_space<vmem>>, vector<128x128xbf16>
    %c0_1 = arith.constant 0 : index
    %c0_2 = arith.constant 0 : index
    %1 = vector.load %arg2[%c0_1, %c0_2] : memref<128x8xbf16, #tpu.memory_space<vmem>>, vector<128x8xbf16>
    %cst = arith.constant dense<0.000000e+00> : vector<128x8xf32>
    %2 = tpu.matmul %0, %1, %cst {dimension_numbers = #tpu.dot_dimension_numbers<[1], [0], [0], [1], [0, 0, 1, 1], [], []>} : vector<128x128xbf16>, vector<128x8xbf16>, vector<128x8xf32> -> vector<128x8xf32>
    %c0_3 = arith.constant 0 : index
    %c0_4 = arith.constant 0 : index
    %3 = vector.load %arg3[%c0_3, %c0_4] : memref<1x8xf32, #tpu.memory_space<vmem>>, vector<1x8xf32>
    %4 = vector.broadcast %3 : vector<1x8xf32> to vector<128x8xf32>
    %5 = arith.addf %2, %4 : vector<128x8xf32>
    %cst_5 = arith.constant dense<0xFF800000> : vector<128xf32>
    %6 = vector.multi_reduction <maximumf>, %5, %cst_5 [1] : vector<128x8xf32> to vector<128xf32>
    %7 = vector.shape_cast %6 : vector<128xf32> to vector<128x1xf32>
    %8 = vector.broadcast %7 : vector<128x1xf32> to vector<128x8xf32>
    %9 = arith.subf %5, %8 : vector<128x8xf32>
    %10 = math.exp %9 : vector<128x8xf32>
    %cst_6 = arith.constant dense<0.000000e+00> : vector<128xf32>
    %11 = vector.multi_reduction <add>, %10, %cst_6 [1] : vector<128x8xf32> to vector<128xf32>
    %12 = vector.shape_cast %11 : vector<128xf32> to vector<128x1xf32>
    %13 = tpu.reciprocal %12 {approx = true} : vector<128x1xf32> -> vector<128x1xf32>
    %14 = vector.broadcast %13 : vector<128x1xf32> to vector<128x8xf32>
    %15 = arith.mulf %10, %14 : vector<128x8xf32>
    %c0_7 = arith.constant 0 : index
    %c0_8 = arith.constant 0 : index
    %16 = vector.load %arg4[%c0_7, %c0_8] : memref<128x8xf32, #tpu.memory_space<vmem>>, vector<128x8xf32>
    tpu.vector_store %arg4[%c0_7, %c0_8], %15 {strides = array<i32>} : memref<128x8xf32, #tpu.memory_space<vmem>>, vector<128x8xf32>,
    return
  }
  func.func @transform_0(%arg0: i32) -> (i32, i32) {
    %c0_i32 = arith.constant 0 : i32
    %c0_i32_0 = arith.constant 0 : i32
    return %arg0, %c0_i32 : i32, i32
  }
  func.func @transform_1(%arg0: i32) -> (i32, i32) {
    %c0_i32 = arith.constant 0 : i32
    %c0_i32_0 = arith.constant 0 : i32
    %c0_i32_1 = arith.constant 0 : i32
    return %c0_i32, %c0_i32_0 : i32, i32
  }
  func.func @transform_2(%arg0: i32) -> (i32, i32) {
    %c0_i32 = arith.constant 0 : i32
    %c0_i32_0 = arith.constant 0 : i32
    %c0_i32_1 = arith.constant 0 : i32
    return %c0_i32, %c0_i32_0 : i32, i32
  }
  func.func @transform_3(%arg0: i32) -> (i32, i32) {
    %c0_i32 = arith.constant 0 : i32
    %c0_i32_0 = arith.constant 0 : i32
    return %arg0, %c0_i32 : i32, i32
  }
}

</mosaic_0001>

<bundles_post_ra>
// kernel: gcn_attention_v3_forward.6
= control target key start
LH: loop header
LB: loop body
LE: loop exit
PB: predicated region body
PF: predicated region fallthrough
CT: control target
= control target key end

     0   :  { %vm84_vm0 = vcmask 261120   ;;  %vm270_vm1 = vcmask 257024   ;;  %s502_s1 = inlined_call_operand.vmem [shape: bf16[32,32], index: 1, kind: input, shape index: {}]   ;;  %s503_s0 = inlined_call_operand.vmem [shape: bf16[128,32], index: 0, kind: input, shape index: {}]   ;;  %s504_s2 = inlined_call_operand.vmem [shape: bf16[128,32], index: 2, kind: output, shape index: {}]  }
   0x1   :  { %v375_v0 = vld [vmem:[%s502_s1] sm:$0xff]   ;;  %v376_v1 = vld [vmem:[%s502_s1 + $0x8] sm:$0xff]   ;;  %v381_v6 = vld [vmem:[%s503_s0 + $0x10] sm:$0xff]  }
   0x2   :  { %351 = vmatprep.subr.bf16.mxu0 %v375_v0  ;;  %371 = vmatprep.subr.bf16.mxu1 %v375_v0  ;;  %v377_v2 = vld [vmem:[%s503_s0] sm:$0xff]   ;;  %v379_v4 = vld [vmem:[%s503_s0 + $0x8] sm:$0xff]   ;;  %v382_v7 = vld [vmem:[%s503_s0 + $0x30] sm:$0xff]  }
   0x3   :  { %352 = vmatpush3.bf16.msra.mxu0 %v375_v0  ;;  %373 = vmatpush3.bf16.msra.mxu1 %v375_v0  ;;  %v378_v3 = vld [vmem:[%s503_s0 + $0x20] sm:$0xff]   ;;  %v380_v5 = vld [vmem:[%s503_s0 + $0x28] sm:$0xff]   ;;  %v383_v8 = vld [vmem:[%s503_s0 + $0x18] sm:$0xff]  }
   0x4   :  { %353 = vmatprep.subr.bf16.mxu0 %v376_v1  ;;  %372 = vmatprep.subr.bf16.mxu1 %v376_v1  ;;  %v384_v9 = vld [vmem:[%s503_s0 + $0x38] sm:$0xff]  }
   0x5   :  { %355 = vmatprep.mubr.msk.bf16.mxu0 %vm84_vm0, %v377_v2  ;;  %363 = vmatprep.mubr.msk.bf16.mxu1 %vm84_vm0, %v378_v3 }
   0x7   :  { %354 = vmatpush3.bf16.msra.mxu0 %v376_v1  ;;  %374 = vmatpush3.bf16.msra.mxu1 %v376_v1 }
   0xa   :  { %356 = vmatmul.mubr.msk.bf16.vlgmr.msra.gmra.mrb[0].mxu0 %vm84_vm0, %v379_v4  ;;  %364 = vmatmul.mubr.msk.bf16.vlgmr.msra.gmra.mrb[0].mxu1 %vm84_vm0, %v380_v5 }
   0xb   :  { %359 = vmatprep.mubr.msk.bf16.mxu0 %vm84_vm0, %v381_v6  ;;  %367 = vmatprep.mubr.msk.bf16.mxu1 %vm84_vm0, %v382_v7 }
  0x12   :  { %360 = vmatmul.mubr.msk.bf16.gmra.mrb[4].mxu0 %vm84_vm0, %v383_v8  ;;  %368 = vmatmul.mubr.msk.bf16.gmra.mrb[4].mxu1 %vm84_vm0, %v384_v9 }
  0xdd   :  { %v357_v10 = vpop.f32.mrb[0].mxu0  ;;  %v365_v11 = vpop.f32.mrb[0].mxu1 }
  0xde   :  { %v327_v12 = vpack.c.bf16 %v357_v10, %v357_v10  ;;  %v335_v13 = vpack.c.bf16 %v365_v11, %v365_v11  ;;  %v143_v14 = vpop.f32.mrb[1].mxu0  ;;  %v175_v15 = vpop.f32.mrb[1].mxu1 }
  0xdf   :  { %v325_v16 = vpack.c.bf16 %v143_v14, %v143_v14  ;;  %v333_v17 = vpack.c.bf16 %v175_v15, %v175_v15  ;;  %v358_v18 = vpop.f32.mrb[2].mxu0  ;;  %v366_v19 = vpop.f32.mrb[2].mxu1 }
  0xe0   :  { %273 = vst.msk [vmem:[%s504_s2 + $0x8] sm:$0xf] %vm270_vm1, %v327_v12  ;;  %281 = vst.msk [vmem:[%s504_s2 + $0x28] sm:$0xf] %vm270_vm1, %v335_v13  ;;  %v328_v20 = vpack.c.bf16 %v358_v18, %v358_v18  ;;  %v336_v21 = vpack.c.bf16 %v366_v19, %v366_v19  ;;  %v146_v22 = vpop.f32.mrb[3].mxu0  ;;  %v178_v23 = vpop.f32.mrb[3].mxu1 }
  0xe1   :  { %271 = vst.msk [vmem:[%s504_s2] sm:$0xf] %vm270_vm1, %v325_v16  ;;  %279 = vst.msk [vmem:[%s504_s2 + $0x20] sm:$0xf] %vm270_vm1, %v333_v17  ;;  %v326_v24 = vpack.c.bf16 %v146_v22, %v146_v22  ;;  %v334_v25 = vpack.c.bf16 %v178_v23, %v178_v23 }
  0xe2   :  { %274 = vst.msk [vmem:[%s504_s2 + $0xc] sm:$0xf] %vm270_vm1, %v328_v20  ;;  %282 = vst.msk [vmem:[%s504_s2 + $0x2c] sm:$0xf] %vm270_vm1, %v336_v21 }
  0xe3   :  { %272 = vst.msk [vmem:[%s504_s2 + $0x4] sm:$0xf] %vm270_vm1, %v326_v24  ;;  %280 = vst.msk [vmem:[%s504_s2 + $0x24] sm:$0xf] %vm270_vm1, %v334_v25 }
  0xe5   :  { %v361_v26 = vpop.f32.mrb[4].mxu0  ;;  %v369_v27 = vpop.f32.mrb[4].mxu1 }
  0xe6   :  { %v331_v28 = vpack.c.bf16 %v361_v26, %v361_v26  ;;  %v339_v29 = vpack.c.bf16 %v369_v27, %v369_v27  ;;  %v159_v30 = vpop.f32.mrb[5].mxu0  ;;  %v191_v31 = vpop.f32.mrb[5].mxu1 }
  0xe7   :  { %v329_v32 = vpack.c.bf16 %v159_v30, %v159_v30  ;;  %v337_v33 = vpack.c.bf16 %v191_v31, %v191_v31  ;;  %v362_v34 = vpop.f32.mrb[6].mxu0  ;;  %v370_v35 = vpop.f32.mrb[6].mxu1 }
  0xe8   :  { %277 = vst.msk [vmem:[%s504_s2 + $0x18] sm:$0xf] %vm270_vm1, %v331_v28  ;;  %285 = vst.msk [vmem:[%s504_s2 + $0x38] sm:$0xf] %vm270_vm1, %v339_v29  ;;  %v332_v36 = vpack.c.bf16 %v362_v34, %v362_v34  ;;  %v340_v37 = vpack.c.bf16 %v370_v35, %v370_v35  ;;  %v162_v38 = vpop.f32.mrb[7].mxu0  ;;  %v194_v39 = vpop.f32.mrb[7].mxu1 }
  0xe9   :  { %275 = vst.msk [vmem:[%s504_s2 + $0x10] sm:$0xf] %vm270_vm1, %v329_v32  ;;  %283 = vst.msk [vmem:[%s504_s2 + $0x30] sm:$0xf] %vm270_vm1, %v337_v33  ;;  %v330_v40 = vpack.c.bf16 %v162_v38, %v162_v38  ;;  %v338_v41 = vpack.c.bf16 %v194_v39, %v194_v39 }
  0xea   :  { %278 = vst.msk [vmem:[%s504_s2 + $0x1c] sm:$0xf] %vm270_vm1, %v332_v36  ;;  %286 = vst.msk [vmem:[%s504_s2 + $0x3c] sm:$0xf] %vm270_vm1, %v340_v37 }
  0xeb   :  { %276 = vst.msk [vmem:[%s504_s2 + $0x14] sm:$0xf] %vm270_vm1, %v330_v40  ;;  %284 = vst.msk [vmem:[%s504_s2 + $0x34] sm:$0xf] %vm270_vm1, %v338_v41 }

// kernel: gcn_attention_v3_forward.8
= control target key start
LH: loop header
LB: loop body
LE: loop exit
PB: predicated region body
PF: predicated region fallthrough
CT: control target
= control target key end

     0   :  { %vm290_vm0 = vcmask 261120   ;;  %vm476_vm1 = vcmask 60416   ;;  %s806_s1 = inlined_call_operand.vmem [shape: bf16[128,32], index: 1, kind: input, shape index: {}]   ;;  %s807_s0 = inlined_call_operand.vmem [shape: bf16[128,128], index: 0, kind: input, shape index: {}]   ;;  %s808_s3 = inlined_call_operand.vmem [shape: bf16[32,8], index: 3, kind: input, shape index: {}]   ;;  %s809_s2 = inlined_call_operand.vmem [shape: f32[1,32], index: 2, kind: input, shape index: {}]   ;;  %s810_s4 = inlined_call_operand.vmem [shape: bf16[128,8], index: 4, kind: output, shape index: {}]  }
   0x1   :  { %v634_v0 = vld [vmem:[%s806_s1] sm:$0xff]   ;;  %v635_v1 = vld [vmem:[%s806_s1 + $0x8] sm:$0xff]   ;;  %v636_v2 = vld [vmem:[%s806_s1 + $0x10] sm:$0xff]  }
   0x2   :  { %582 = vmatprep.subr.bf16.mxu0 %v634_v0  ;;  %v637_v3 = vld [vmem:[%s806_s1 + $0x18] sm:$0xff]   ;;  %v642_v4 = vld [vmem:[%s807_s0] sm:$0xff]   ;;  %v639_v6 = vld [vmem:[%s806_s1 + $0x28] sm:$0xff]  }
   0x3   :  { %583 = vmatpush3.bf16.msra.mxu0 %v634_v0  ;;  %598 = vmatprep.mubr.bf16.mxu0 %v642_v4  ;;  %v638_v5 = vld [vmem:[%s806_s1 + $0x20] sm:$0xff]   ;;  %v640_v7 = vld [vmem:[%s806_s1 + $0x30] sm:$0xff]   ;;  %v641_v8 = vld [vmem:[%s806_s1 + $0x38] sm:$0xff]  }
   0x4   :  { %584 = vmatprep.subr.bf16.mxu0 %v635_v1  ;;  %v643_v9 = vld [vmem:[%s807_s0 + $0x8] sm:$0xff]   ;;  %v644_v10 = vld [vmem:[%s807_s0 + $0x10] sm:$0xff]   ;;  %v645_v11 = vld [vmem:[%s807_s0 + $0x18] sm:$0xff]  }
   0x5   :  { %v646_v12 = vld [vmem:[%s807_s0 + $0x20] sm:$0xff]   ;;  %v647_v13 = vld [vmem:[%s807_s0 + $0x28] sm:$0xff]   ;;  %v648_v14 = vld [vmem:[%s807_s0 + $0x30] sm:$0xff]  }
   0x6   :  { %v649_v15 = vld [vmem:[%s807_s0 + $0x38] sm:$0xff]   ;;  %v650_v16 = vld [vmem:[%s808_s3] sm:$0xff]   ;;  %v651_v17 = vld [vmem:[%s808_s3 + $0x8] sm:$0xff]  }
   0x7   :  { %585 = vmatpush3.bf16.msra.mxu0 %v635_v1  ;;  %614 = vmatprep.subr.bf16.mxu1 %v650_v16  ;;  %v497_v18 = vld [vmem:[%s809_s2] ss:$0 sm:$0xff] }
   0x8   :  { %586 = vmatprep.subr.bf16.mxu0 %v636_v2  ;;  %615 = vmatpush3.bf16.msra.mxu1 %v650_v16 }
   0x9   :  { %616 = vmatprep.subr.bf16.mxu1 %v651_v17 }
   0xb   :  { %587 = vmatpush3.bf16.msra.mxu0 %v636_v2 }
   0xc   :  { %588 = vmatprep.subr.bf16.mxu0 %v637_v3  ;;  %617 = vmatpush3.bf16.msra.mxu1 %v651_v17 }
   0xf   :  { %589 = vmatpush3.bf16.msra.mxu0 %v637_v3 }
  0x10   :  { %590 = vmatprep.subr.bf16.mxu0 %v638_v5 }
  0x13   :  { %591 = vmatpush3.bf16.msra.mxu0 %v638_v5 }
  0x14   :  { %592 = vmatprep.subr.bf16.mxu0 %v639_v6 }
  0x17   :  { %593 = vmatpush3.bf16.msra.mxu0 %v639_v6 }
  0x18   :  { %594 = vmatprep.subr.bf16.mxu0 %v640_v7 }
  0x1b   :  { %595 = vmatpush3.bf16.msra.mxu0 %v640_v7 }
  0x1c   :  { %596 = vmatprep.subr.bf16.mxu0 %v641_v8 }
  0x1f   :  { %597 = vmatpush3.bf16.msra.mxu0 %v641_v8 }
  0x22   :  { %599 = vmatmul.mubr.bf16.vlgmr.msra.gmra.mrb[0].mxu0 %v643_v9 }
  0x23   :  { %602 = vmatprep.mubr.bf16.mxu0 %v644_v10 }
  0x2a   :  { %603 = vmatmul.mubr.bf16.gmra.mrb[4].mxu0 %v645_v11 }
  0x2b   :  { %606 = vmatprep.mubr.bf16.mxu0 %v646_v12 }
  0x32   :  { %607 = vmatmul.mubr.bf16.gmra.mrb[8].mxu0 %v647_v13 }
  0x33   :  { %610 = vmatprep.mubr.bf16.mxu0 %v648_v14 }
  0x3a   :  { %611 = vmatmul.mubr.bf16.gmra.mrb[12].mxu0 %v649_v15 }
  0xf5   :  { %v600_v19 = vpop.f32.mrb[0].mxu0 }
  0xf6   :  { %v196_v20 = vadd.f32 %v600_v19, %v497_v18  ;;  %v187_v21 = vpop.f32.mrb[1].mxu0 }
  0xf7   :  { %v188_v22 = vadd.f32 %v497_v18, %v187_v21  ;;  %v601_v23 = vpop.f32.mrb[2].mxu0 }
  0xf8   :  { %v199_v24 = vadd.f32 %v601_v23, %v497_v18  ;;  %v190_v25 = vpop.f32.mrb[3].mxu0  ;;  %v252_v27 = vmax.f32 %v196_v20, 0.0 }
  0xf9   :  { %v191_v26 = vadd.f32 %v497_v18, %v190_v25  ;;  %v250_v29 = vmax.f32 %v188_v22, 0.0 }
  0xfa   :  { %v253_v28 = vmax.f32 %v199_v24, 0.0 }
  0xfb   :  { %v251_v30 = vmax.f32 %v191_v26, 0.0 }
  0xfc   :  { %v267_v31 = vpack.c.bf16 %v253_v28, %v252_v27 }
  0xfd   :  { %v604_v32 = vpop.f32.mrb[4].mxu0  ;;  %v266_v33 = vpack.c.bf16 %v251_v30, %v250_v29 }
  0xfe   :  { %v212_v34 = vadd.f32 %v604_v32, %v497_v18  ;;  %v203_v35 = vpop.f32.mrb[5].mxu0 }
  0xff   :  { %v204_v36 = vadd.f32 %v497_v18, %v203_v35  ;;  %v605_v37 = vpop.f32.mrb[6].mxu0  ;;  %618 = vmatprep.mubr.msk.bf16.mxu1 %vm290_vm0, %v266_v33 }
 0x100   :  { %v215_v38 = vadd.f32 %v605_v37, %v497_v18  ;;  %v206_v39 = vpop.f32.mrb[7].mxu0  ;;  %619 = vmatmul.mubr.msk.bf16.vlgmr.msra.gmra.mrb[0].mxu1 %vm290_vm0, %v267_v31  ;;  %v256_v41 = vmax.f32 %v212_v34, 0.0 }
 0x101   :  { %v207_v40 = vadd.f32 %v497_v18, %v206_v39  ;;  %v254_v43 = vmax.f32 %v204_v36, 0.0 }
 0x102   :  { %v257_v42 = vmax.f32 %v215_v38, 0.0 }
 0x103   :  { %v255_v44 = vmax.f32 %v207_v40, 0.0 }
 0x104   :  { %v269_v45 = vpack.c.bf16 %v257_v42, %v256_v41 }
 0x105   :  { %v268_v46 = vpack.c.bf16 %v255_v44, %v254_v43  ;;  %v608_v47 = vpop.f32.mrb[8].mxu0 }
 0x106   :  { %v228_v48 = vadd.f32 %v608_v47, %v497_v18  ;;  %v219_v49 = vpop.f32.mrb[9].mxu0 }
 0x107   :  { %v220_v50 = vadd.f32 %v497_v18, %v219_v49  ;;  %v609_v51 = vpop.f32.mrb[10].mxu0  ;;  %622 = vmatprep.mubr.msk.bf16.mxu1 %vm290_vm0, %v268_v46 }
 0x108   :  { %v231_v52 = vadd.f32 %v609_v51, %v497_v18  ;;  %v222_v53 = vpop.f32.mrb[11].mxu0  ;;  %623 = vmatmul.mubr.msk.bf16.gmra.mrb[4].mxu1 %vm290_vm0, %v269_v45  ;;  %v260_v55 = vmax.f32 %v228_v48, 0.0 }
 0x109   :  { %v223_v54 = vadd.f32 %v497_v18, %v222_v53  ;;  %v258_v57 = vmax.f32 %v220_v50, 0.0 }
 0x10a   :  { %v261_v56 = vmax.f32 %v231_v52, 0.0 }
 0x10b   :  { %v259_v58 = vmax.f32 %v223_v54, 0.0 }
 0x10c   :  { %v271_v59 = vpack.c.bf16 %v261_v56, %v260_v55 }
 0x10d   :  { %v270_v60 = vpack.c.bf16 %v259_v58, %v258_v57  ;;  %v612_v61 = vpop.f32.mrb[12].mxu0 }
 0x10e   :  { %v244_v62 = vadd.f32 %v612_v61, %v497_v18  ;;  %v235_v63 = vpop.f32.mrb[13].mxu0 }
 0x10f   :  { %v236_v0 = vadd.f32 %v497_v18, %v235_v63  ;;  %v613_v1 = vpop.f32.mrb[14].mxu0  ;;  %626 = vmatprep.mubr.msk.bf16.mxu1 %vm290_vm0, %v270_v60 }
 0x110   :  { %v247_v2 = vadd.f32 %v613_v1, %v497_v18  ;;  %v238_v3 = vpop.f32.mrb[15].mxu0  ;;  %627 = vmatmul.mubr.msk.bf16.gmra.mrb[8].mxu1 %vm290_vm0, %v271_v59  ;;  %v264_v5 = vmax.f32 %v244_v62, 0.0 }
 0x111   :  { %v239_v4 = vadd.f32 %v497_v18, %v238_v3  ;;  %v262_v7 = vmax.f32 %v236_v0, 0.0 }
 0x112   :  { %v265_v6 = vmax.f32 %v247_v2, 0.0 }
 0x113   :  { %v263_v8 = vmax.f32 %v239_v4, 0.0 }
 0x114   :  { %v273_v9 = vpack.c.bf16 %v265_v6, %v264_v5 }
 0x115   :  { %v272_v10 = vpack.c.bf16 %v263_v8, %v262_v7 }
 0x117   :  { %630 = vmatprep.mubr.msk.bf16.mxu1 %vm290_vm0, %v272_v10 }
 0x118   :  { %631 = vmatmul.mubr.msk.bf16.gmra.mrb[12].mxu1 %vm290_vm0, %v273_v9 }
 0x1d3   :  { %v620_v11 = vpop.f32.mrb[0].mxu1 }
 0x1d4   :  { %v542_v12 = vpack.c.bf16 %v620_v11, %v620_v11  ;;  %v349_v13 = vpop.f32.mrb[1].mxu1 }
 0x1d5   :  { %v540_v14 = vpack.c.bf16 %v349_v13, %v349_v13  ;;  %v621_v15 = vpop.f32.mrb[2].mxu1 }
 0x1d6   :  { %479 = vst.msk [vmem:[%s810_s4 + $0x8] sm:$0xf] %vm476_vm1, %v542_v12  ;;  %v543_v16 = vpack.c.bf16 %v621_v15, %v621_v15  ;;  %v352_v17 = vpop.f32.mrb[3].mxu1 }
 0x1d7   :  { %477 = vst.msk [vmem:[%s810_s4] sm:$0xf] %vm476_vm1, %v540_v14  ;;  %v541_v18 = vpack.c.bf16 %v352_v17, %v352_v17 }
 0x1d8   :  { %480 = vst.msk [vmem:[%s810_s4 + $0xc] sm:$0xf] %vm476_vm1, %v543_v16 }
 0x1d9   :  { %478 = vst.msk [vmem:[%s810_s4 + $0x4] sm:$0xf] %vm476_vm1, %v541_v18 }
 0x1db   :  { %v624_v19 = vpop.f32.mrb[4].mxu1 }
 0x1dc   :  { %v546_v20 = vpack.c.bf16 %v624_v19, %v624_v19  ;;  %v365_v21 = vpop.f32.mrb[5].mxu1 }
 0x1dd   :  { %v544_v22 = vpack.c.bf16 %v365_v21, %v365_v21  ;;  %v625_v23 = vpop.f32.mrb[6].mxu1 }
 0x1de   :  { %483 = vst.msk [vmem:[%s810_s4 + $0x18] sm:$0xf] %vm476_vm1, %v546_v20  ;;  %v547_v24 = vpack.c.bf16 %v625_v23, %v625_v23  ;;  %v368_v25 = vpop.f32.mrb[7].mxu1 }
 0x1df   :  { %481 = vst.msk [vmem:[%s810_s4 + $0x10] sm:$0xf] %vm476_vm1, %v544_v22  ;;  %v545_v26 = vpack.c.bf16 %v368_v25, %v368_v25 }
 0x1e0   :  { %484 = vst.msk [vmem:[%s810_s4 + $0x1c] sm:$0xf] %vm476_vm1, %v547_v24 }
 0x1e1   :  { %482 = vst.msk [vmem:[%s810_s4 + $0x14] sm:$0xf] %vm476_vm1, %v545_v26 }
 0x1e3   :  { %v628_v27 = vpop.f32.mrb[8].mxu1 }
 0x1e4   :  { %v550_v28 = vpack.c.bf16 %v628_v27, %v628_v27  ;;  %v381_v29 = vpop.f32.mrb[9].mxu1 }
 0x1e5   :  { %v548_v30 = vpack.c.bf16 %v381_v29, %v381_v29  ;;  %v629_v31 = vpop.f32.mrb[10].mxu1 }
 0x1e6   :  { %487 = vst.msk [vmem:[%s810_s4 + $0x28] sm:$0xf] %vm476_vm1, %v550_v28  ;;  %v551_v32 = vpack.c.bf16 %v629_v31, %v629_v31  ;;  %v384_v33 = vpop.f32.mrb[11].mxu1 }
 0x1e7   :  { %485 = vst.msk [vmem:[%s810_s4 + $0x20] sm:$0xf] %vm476_vm1, %v548_v30  ;;  %v549_v34 = vpack.c.bf16 %v384_v33, %v384_v33 }
 0x1e8   :  { %488 = vst.msk [vmem:[%s810_s4 + $0x2c] sm:$0xf] %vm476_vm1, %v551_v32 }
 0x1e9   :  { %486 = vst.msk [vmem:[%s810_s4 + $0x24] sm:$0xf] %vm476_vm1, %v549_v34 }
 0x1eb   :  { %v632_v35 = vpop.f32.mrb[12].mxu1 }
 0x1ec   :  { %v554_v36 = vpack.c.bf16 %v632_v35, %v632_v35  ;;  %v397_v37 = vpop.f32.mrb[13].mxu1 }
 0x1ed   :  { %v552_v38 = vpack.c.bf16 %v397_v37, %v397_v37  ;;  %v633_v39 = vpop.f32.mrb[14].mxu1 }
 0x1ee   :  { %491 = vst.msk [vmem:[%s810_s4 + $0x38] sm:$0xf] %vm476_vm1, %v554_v36  ;;  %v555_v40 = vpack.c.bf16 %v633_v39, %v633_v39  ;;  %v400_v41 = vpop.f32.mrb[15].mxu1 }
 0x1ef   :  { %489 = vst.msk [vmem:[%s810_s4 + $0x30] sm:$0xf] %vm476_vm1, %v552_v38  ;;  %v553_v42 = vpack.c.bf16 %v400_v41, %v400_v41 }
 0x1f0   :  { %492 = vst.msk [vmem:[%s810_s4 + $0x3c] sm:$0xf] %vm476_vm1, %v555_v40 }
 0x1f1   :  { %490 = vst.msk [vmem:[%s810_s4 + $0x34] sm:$0xf] %vm476_vm1, %v553_v42 }

// kernel: gcn_attention_v3_forward.7
= control target key start
LH: loop header
LB: loop body
LE: loop exit
PB: predicated region body
PF: predicated region fallthrough
CT: control target
= control target key end

     0   :  { %vm524_vm0 = vcmask 261120   ;;  %vm710_vm1 = vcmask 257024   ;;  %s1509_s4 = inlined_call_operand.vmem [shape: bf16[128,32], index: 4, kind: input, shape index: {}]   ;;  %s1510_s0 = inlined_call_operand.vmem [shape: f32[3,128], index: 0, kind: input, shape index: {}]   ;;  %s1511_s1 = inlined_call_operand.vmem [shape: bf16[128,128], index: 1, kind: input, shape index: {}]   ;;  %s1512_s2 = inlined_call_operand.vmem [shape: bf16[128,128], index: 2, kind: input, shape index: {}]   ;;  %s1513_s3 = inlined_call_operand.vmem [shape: bf16[128,128], index: 3, kind: input, shape index: {}]   ;;  %s1514_s7 = inlined_call_operand.vmem [shape: bf16[128,128], index: 7, kind: output, shape index: {0}]   ;;  %s1515_s6 = inlined_call_operand.vmem [shape: bf16[32,32], index: 6, kind: input, shape index: {}]   ;;  %s1516_s5 = inlined_call_operand.vmem [shape: f32[1,32], index: 5, kind: input, shape index: {}]   ;;  %s1517_s8 = inlined_call_operand.vmem [shape: bf16[128,32], index: 8, kind: output, shape index: {1}]  }
   0x1   :  { %v950_v0 = vld [vmem:[%s1509_s4] sm:$0xff]   ;;  %v1009_v1 = vld [vmem:[%s1509_s4 + $0x8] sm:$0xff]   ;;  %v1010_v2 = vld [vmem:[%s1509_s4 + $0x10] sm:$0xff]  }
   0x2   :  { %1135 = vmatprep.subr.bf16.mxu0 %v950_v0  ;;  %v1225_v3 = vld [vmem:[%s1510_s0] ss:$0 sm:$0xff]  ;;  %v1233_v5 = vld [vmem:[%s1510_s0 + $0x1] ss:$0 sm:$0xff]  ;;  %v1241_v11 = vld [vmem:[%s1510_s0 + $0x2] ss:$0 sm:$0xff] }
   0x3   :  { %1137 = vmatpush3.bf16.msra.mxu0 %v950_v0  ;;  %v814_v4 = vld [vmem:[%s1511_s1] sm:$0xff]   ;;  %v981_v13 = vld [vmem:[%s1511_s1 + $0x8] sm:$0xff]   ;;  %v982_v24 = vld [vmem:[%s1511_s1 + $0x10] sm:$0xff]  }
   0x4   :  { %1139 = vmatprep.subr.bf16.mxu0 %v1009_v1  ;;  %v846_v6 = vld [vmem:[%s1512_s2] sm:$0xff]   ;;  %v815_v7 = vunpack.c.l.bf16 %v814_v4  ;;  %v816_v8 = vunpack.c.h.bf16 %v814_v4  ;;  %v819_v16 = vunpack.c.l.bf16 %v981_v13  ;;  %v988_v17 = vld [vmem:[%s1512_s2 + $0x8] sm:$0xff]   ;;  %v820_v19 = vunpack.c.h.bf16 %v981_v13  ;;  %v989_v29 = vld [vmem:[%s1512_s2 + $0x10] sm:$0xff]  }
   0x5   :  { %v847_v9 = vunpack.c.l.bf16 %v846_v6  ;;  %v848_v10 = vunpack.c.h.bf16 %v846_v6  ;;  %v878_v12 = vld [vmem:[%s1513_s3] sm:$0xff]   ;;  %v995_v18 = vld [vmem:[%s1513_s3 + $0x8] sm:$0xff]   ;;  %v851_v28 = vunpack.c.l.bf16 %v988_v17  ;;  %v1011_v30 = vld [vmem:[%s1509_s4 + $0x18] sm:$0xff]   ;;  %v852_v36 = vunpack.c.h.bf16 %v988_v17 }
   0x6   :  { %v879_v14 = vunpack.c.l.bf16 %v878_v12  ;;  %v880_v15 = vunpack.c.h.bf16 %v878_v12  ;;  %v66_v20 = vmul.f32 %v815_v7, %v1225_v3  ;;  %v67_v21 = vmul.f32 %v816_v8, %v1225_v3  ;;  %v996_v39 = vld [vmem:[%s1513_s3 + $0x10] sm:$0xff]   ;;  %v983_v48 = vld [vmem:[%s1511_s1 + $0x18] sm:$0xff]   ;;  %v1012_v49 = vld [vmem:[%s1509_s4 + $0x20] sm:$0xff]  }
   0x7   :  { %1141 = vmatpush3.bf16.msra.mxu0 %v1009_v1  ;;  %v119_v22 = vmul.f32 %v847_v9, %v1233_v5  ;;  %v120_v23 = vmul.f32 %v848_v10, %v1233_v5  ;;  %v68_v27 = vmul.f32 %v819_v16, %v1225_v3  ;;  %v883_v33 = vunpack.c.l.bf16 %v995_v18  ;;  %v990_v54 = vld [vmem:[%s1512_s2 + $0x18] sm:$0xff]   ;;  %v984_v6 = vld [vmem:[%s1511_s1 + $0x20] sm:$0xff]   ;;  %v1013_v7 = vld [vmem:[%s1509_s4 + $0x28] sm:$0xff]  }
   0x8   :  { %1143 = vmatprep.subr.bf16.mxu0 %v1010_v2  ;;  %v188_v25 = vmul.f32 %v879_v14, %v1241_v11  ;;  %v189_v26 = vmul.f32 %v880_v15, %v1241_v11  ;;  %v69_v34 = vmul.f32 %v820_v19, %v1225_v3  ;;  %v121_v35 = vmul.f32 %v851_v28, %v1233_v5  ;;  %v997_v59 = vld [vmem:[%s1513_s3 + $0x18] sm:$0xff]   ;;  %v991_v13 = vld [vmem:[%s1512_s2 + $0x20] sm:$0xff]  }
   0x9   :  { %v135_v31 = vadd.f32 %v119_v22, %v66_v20  ;;  %v136_v32 = vadd.f32 %v120_v23, %v67_v21  ;;  %v884_v37 = vunpack.c.h.bf16 %v995_v18  ;;  %v823_v38 = vunpack.c.l.bf16 %v982_v24  ;;  %v998_v18 = vld [vmem:[%s1513_s3 + $0x20] sm:$0xff]  }
   0xa   :  { %v190_v42 = vmul.f32 %v883_v33, %v1241_v11  ;;  %v855_v43 = vunpack.c.l.bf16 %v989_v29  ;;  %v137_v44 = vadd.f32 %v121_v35, %v68_v27  ;;  %v122_v45 = vmul.f32 %v852_v36, %v1233_v5  ;;  %v1014_v27 = vld [vmem:[%s1509_s4 + $0x30] sm:$0xff]   ;;  %v992_v33 = vld [vmem:[%s1512_s2 + $0x28] sm:$0xff]  }
   0xb   :  { %1145 = vmatpush3.bf16.msra.mxu0 %v1010_v2  ;;  %v204_v40 = vadd.f32 %v188_v25, %v135_v31  ;;  %v1276_v41 = vadd.f32 %v189_v26, %v136_v32  ;;  %v191_v46 = vmul.f32 %v884_v37, %v1241_v11  ;;  %v70_v47 = vmul.f32 %v823_v38, %v1225_v3  ;;  %v985_v32 = vld [vmem:[%s1511_s1 + $0x28] sm:$0xff]  }
   0xc   :  { %1147 = vmatprep.subr.bf16.mxu0 %v1011_v30  ;;  %v123_v51 = vmul.f32 %v855_v43, %v1233_v5  ;;  %v887_v52 = vunpack.c.l.bf16 %v996_v39  ;;  %v824_v53 = vunpack.c.h.bf16 %v982_v24  ;;  %v1293_v55 = vadd.f32 %v190_v42, %v137_v44  ;;  %v999_v38 = vld [vmem:[%s1513_s3 + $0x28] sm:$0xff]  }
   0xd   :  { %v912_v50 = vpack.c.bf16 %v1276_v41, %v204_v40  ;;  %1090 = vmatprep.mubr.f32.mxu0 %v204_v40  ;;  %v138_v56 = vadd.f32 %v122_v45, %v69_v34  ;;  %v856_v57 = vunpack.c.h.bf16 %v989_v29  ;;  %v888_v58 = vunpack.c.h.bf16 %v996_v39 }
   0xe   :  { %v139_v60 = vadd.f32 %v123_v51, %v70_v47  ;;  %v192_v61 = vmul.f32 %v887_v52, %v1241_v11  ;;  %v71_v62 = vmul.f32 %v824_v53, %v1225_v3  ;;  %v827_v63 = vunpack.c.l.bf16 %v983_v48  ;;  %v986_v53 = vld [vmem:[%s1511_s1 + $0x30] sm:$0xff]  }
   0xf   :  { %1149 = vmatpush3.bf16.msra.mxu0 %v1011_v30  ;;  %913 = vst [vmem:[%s1514_s7] sm:$0xff] %v912_v50   ;;  %v1303_v0 = vadd.f32 %v191_v46, %v138_v56  ;;  %v124_v1 = vmul.f32 %v856_v57, %v1233_v5  ;;  %v193_v2 = vmul.f32 %v888_v58, %v1241_v11  ;;  %v859_v4 = vunpack.c.l.bf16 %v990_v54 }
  0x10   :  { %1151 = vmatprep.subr.bf16.mxu0 %v1012_v49  ;;  %v1313_v8 = vadd.f32 %v192_v61, %v139_v60  ;;  %v72_v9 = vmul.f32 %v827_v63, %v1225_v3  ;;  %v891_v10 = vunpack.c.l.bf16 %v997_v59  ;;  %v828_v12 = vunpack.c.h.bf16 %v983_v48  ;;  %v1015_v48 = vld [vmem:[%s1509_s4 + $0x38] sm:$0xff]   ;;  %v1000_v60 = vld [vmem:[%s1513_s3 + $0x30] sm:$0xff]  }
  0x11   :  { %v917_v14 = vpack.c.bf16 %v1303_v0, %v1293_v55  ;;  %v140_v15 = vadd.f32 %v124_v1, %v71_v62  ;;  %v125_v16 = vmul.f32 %v859_v4, %v1233_v5  ;;  %v860_v17 = vunpack.c.h.bf16 %v990_v54  ;;  %v993_v54 = vld [vmem:[%s1512_s2 + $0x30] sm:$0xff]  }
  0x12   :  { %v194_v19 = vmul.f32 %v891_v10, %v1241_v11  ;;  %v73_v20 = vmul.f32 %v828_v12, %v1225_v3  ;;  %v892_v21 = vunpack.c.h.bf16 %v997_v59  ;;  %v831_v22 = vunpack.c.l.bf16 %v984_v6 }
  0x13   :  { %1153 = vmatpush3.bf16.msra.mxu0 %v1012_v49  ;;  %1002 = vst [vmem:[%s1514_s7 + $0x8] sm:$0xff] %v917_v14   ;;  %v1330_v23 = vadd.f32 %v193_v2, %v140_v15  ;;  %v141_v24 = vadd.f32 %v125_v16, %v72_v9  ;;  %v126_v25 = vmul.f32 %v860_v17, %v1233_v5  ;;  %v863_v26 = vunpack.c.l.bf16 %v991_v13  ;;  %v987_v14 = vld [vmem:[%s1511_s1 + $0x38] sm:$0xff]  }
  0x14   :  { %1155 = vmatprep.subr.bf16.mxu0 %v1013_v7  ;;  %v195_v28 = vmul.f32 %v892_v21, %v1241_v11  ;;  %v74_v29 = vmul.f32 %v831_v22, %v1225_v3  ;;  %v895_v30 = vunpack.c.l.bf16 %v998_v18  ;;  %v832_v31 = vunpack.c.h.bf16 %v984_v6 }
  0x15   :  { %v922_v34 = vpack.c.bf16 %v1330_v23, %v1313_v8  ;;  %v1346_v35 = vadd.f32 %v194_v19, %v141_v24  ;;  %v142_v36 = vadd.f32 %v126_v25, %v73_v20  ;;  %v127_v37 = vmul.f32 %v863_v26, %v1233_v5  ;;  %v994_v19 = vld [vmem:[%s1512_s2 + $0x38] sm:$0xff]  }
  0x16   :  { %v196_v39 = vmul.f32 %v895_v30, %v1241_v11  ;;  %v75_v40 = vmul.f32 %v832_v31, %v1225_v3  ;;  %v864_v42 = vunpack.c.h.bf16 %v991_v13  ;;  %v896_v43 = vunpack.c.h.bf16 %v998_v18  ;;  %v1001_v20 = vld [vmem:[%s1513_s3 + $0x38] sm:$0xff]  }
  0x17   :  { %1157 = vmatpush3.bf16.msra.mxu0 %v1013_v7  ;;  %1003 = vst [vmem:[%s1514_s7 + $0x10] sm:$0xff] %v922_v34   ;;  %v1357_v44 = vadd.f32 %v195_v28, %v142_v36  ;;  %v143_v45 = vadd.f32 %v127_v37, %v74_v29  ;;  %v835_v46 = vunpack.c.l.bf16 %v985_v32  ;;  %v867_v47 = vunpack.c.l.bf16 %v992_v33 }
  0x18   :  { %1159 = vmatprep.subr.bf16.mxu0 %v1014_v27  ;;  %v128_v49 = vmul.f32 %v864_v42, %v1233_v5  ;;  %v197_v50 = vmul.f32 %v896_v43, %v1241_v11  ;;  %v899_v51 = vunpack.c.l.bf16 %v999_v38  ;;  %v836_v52 = vunpack.c.h.bf16 %v985_v32 }
  0x19   :  { %v927_v56 = vpack.c.bf16 %v1357_v44, %v1346_v35  ;;  %v1372_v57 = vadd.f32 %v196_v39, %v143_v45  ;;  %v76_v58 = vmul.f32 %v835_v46, %v1225_v3  ;;  %v129_v59 = vmul.f32 %v867_v47, %v1233_v5 }
  0x1a   :  { %v144_v61 = vadd.f32 %v128_v49, %v75_v40  ;;  %v198_v62 = vmul.f32 %v899_v51, %v1241_v11  ;;  %v77_v63 = vmul.f32 %v836_v52, %v1225_v3  ;;  %v868_v1 = vunpack.c.h.bf16 %v992_v33 }
  0x1b   :  { %1161 = vmatpush3.bf16.msra.mxu0 %v1014_v27  ;;  %1004 = vst [vmem:[%s1514_s7 + $0x18] sm:$0xff] %v927_v56   ;;  %v145_v2 = vadd.f32 %v129_v59, %v76_v58  ;;  %v900_v4 = vunpack.c.h.bf16 %v999_v38  ;;  %v839_v6 = vunpack.c.l.bf16 %v986_v53  ;;  %v871_v7 = vunpack.c.l.bf16 %v993_v54 }
  0x1c   :  { %1163 = vmatprep.subr.bf16.mxu0 %v1015_v48  ;;  %v213_v9 = vadd.f32 %v197_v50, %v144_v61  ;;  %v130_v10 = vmul.f32 %v868_v1, %v1233_v5  ;;  %v903_v12 = vunpack.c.l.bf16 %v1000_v60  ;;  %v840_v13 = vunpack.c.h.bf16 %v986_v53 }
  0x1d   :  { %v214_v15 = vadd.f32 %v198_v62, %v145_v2  ;;  %v199_v16 = vmul.f32 %v900_v4, %v1241_v11  ;;  %v78_v17 = vmul.f32 %v839_v6, %v1225_v3  ;;  %v131_v18 = vmul.f32 %v871_v7, %v1233_v5 }
  0x1e   :  { %v932_v21 = vpack.c.bf16 %v213_v9, %v1372_v57  ;;  %v146_v22 = vadd.f32 %v130_v10, %v77_v63  ;;  %v200_v24 = vmul.f32 %v903_v12, %v1241_v11  ;;  %v79_v25 = vmul.f32 %v840_v13, %v1225_v3 }
  0x1f   :  { %1165 = vmatpush3.bf16.msra.mxu0 %v1015_v48  ;;  %v147_v26 = vadd.f32 %v131_v18, %v78_v17  ;;  %v872_v27 = vunpack.c.h.bf16 %v993_v54  ;;  %v904_v28 = vunpack.c.h.bf16 %v1000_v60  ;;  %v843_v29 = vunpack.c.l.bf16 %v987_v14 }
  0x20   :  { %1005 = vst [vmem:[%s1514_s7 + $0x20] sm:$0xff] %v932_v21   ;;  %v215_v30 = vadd.f32 %v199_v16, %v146_v22  ;;  %v875_v31 = vunpack.c.l.bf16 %v994_v19  ;;  %v907_v32 = vunpack.c.l.bf16 %v1001_v20  ;;  %v844_v33 = vunpack.c.h.bf16 %v987_v14 }
  0x21   :  { %v132_v34 = vmul.f32 %v872_v27, %v1233_v5  ;;  %v201_v36 = vmul.f32 %v904_v28, %v1241_v11  ;;  %v80_v37 = vmul.f32 %v843_v29, %v1225_v3  ;;  %v876_v43 = vunpack.c.h.bf16 %v994_v19 }
  0x22   :  { %1091 = vmatmul.mubr.f32.vlgmr.msra.gmra.mrb[0].mxu0 %v1276_v41  ;;  %v937_v38 = vpack.c.bf16 %v215_v30, %v214_v15  ;;  %v133_v39 = vmul.f32 %v875_v31, %v1233_v5  ;;  %v81_v42 = vmul.f32 %v844_v33, %v1225_v3  ;;  %v908_v45 = vunpack.c.h.bf16 %v1001_v20 }
  0x23   :  { %1093 = vmatprep.mubr.f32.mxu0 %v1293_v55  ;;  %v148_v40 = vadd.f32 %v132_v34, %v79_v25  ;;  %v216_v41 = vadd.f32 %v200_v24, %v147_v26  ;;  %v202_v46 = vmul.f32 %v907_v32, %v1241_v11  ;;  %v134_v55 = vmul.f32 %v876_v43, %v1233_v5  ;;  %v1166_v5 = vld [vmem:[%s1515_s6] sm:$0xff]  }
  0x24   :  { %1006 = vst [vmem:[%s1514_s7 + $0x28] sm:$0xff] %v937_v38   ;;  %v149_v48 = vadd.f32 %v133_v39, %v80_v37  ;;  %v203_v49 = vmul.f32 %v908_v45, %v1241_v11  ;;  %1114 = vmatprep.subr.bf16.mxu1 %v1166_v5  ;;  %v1167_v11 = vld [vmem:[%s1515_s6 + $0x8] sm:$0xff]  }
  0x25   :  { %v217_v47 = vadd.f32 %v201_v36, %v148_v40  ;;  %v150_v50 = vadd.f32 %v134_v55, %v81_v42  ;;  %1115 = vmatpush3.bf16.msra.mxu1 %v1166_v5 }
  0x26   :  { %1094 = vmatmul.mubr.f32.gmra.mrb[2].mxu0 %v1303_v0  ;;  %v218_v51 = vadd.f32 %v202_v46, %v149_v48  ;;  %1116 = vmatprep.subr.bf16.mxu1 %v1167_v11 }
  0x27   :  { %1096 = vmatprep.mubr.f32.mxu0 %v1313_v8  ;;  %v942_v3 = vpack.c.bf16 %v217_v47, %v216_v41  ;;  %v219_v52 = vadd.f32 %v203_v49, %v150_v50  ;;  %v754_v8 = vld [vmem:[%s1516_s5] ss:$0 sm:$0xff] }
  0x29   :  { %1007 = vst [vmem:[%s1514_s7 + $0x30] sm:$0xff] %v942_v3   ;;  %v947_v0 = vpack.c.bf16 %v219_v52, %v218_v51  ;;  %1117 = vmatpush3.bf16.msra.mxu1 %v1167_v11 }
  0x2a   :  { %1097 = vmatmul.mubr.f32.gmra.mrb[4].mxu0 %v1330_v23 }
  0x2b   :  { %1099 = vmatprep.mubr.f32.mxu0 %v1346_v35  ;;  %1008 = vst [vmem:[%s1514_s7 + $0x38] sm:$0xff] %v947_v0  }
  0x2e   :  { %1100 = vmatmul.mubr.f32.gmra.mrb[6].mxu0 %v1357_v44 }
  0x2f   :  { %1102 = vmatprep.mubr.f32.mxu0 %v1372_v57 }
  0x32   :  { %1103 = vmatmul.mubr.f32.gmra.mrb[8].mxu0 %v213_v9 }
  0x33   :  { %1105 = vmatprep.mubr.f32.mxu0 %v214_v15 }
  0x36   :  { %1106 = vmatmul.mubr.f32.gmra.mrb[10].mxu0 %v215_v30 }
  0x37   :  { %1108 = vmatprep.mubr.f32.mxu0 %v216_v41 }
  0x3a   :  { %1109 = vmatmul.mubr.f32.gmra.mrb[12].mxu0 %v217_v47 }
  0x3b   :  { %1111 = vmatprep.mubr.f32.mxu0 %v218_v51 }
  0x3e   :  { %1112 = vmatmul.mubr.f32.gmra.mrb[14].mxu0 %v219_v52 }
  0xf5   :  { %v1092_v23 = vpop.f32.mrb[0].mxu0 }
  0xf6   :  { %v411_v35 = vadd.f32 %v1092_v23, %v754_v8  ;;  %v405_v44 = vpop.f32.mrb[1].mxu0 }
  0xf7   :  { %v406_v53 = vadd.f32 %v754_v8, %v405_v44 }
  0xf8   :  { %v485_v54 = vmax.f32 %v411_v35, 0.0 }
  0xf9   :  { %v484_v56 = vmax.f32 %v406_v53, 0.0  ;;  %v1095_v57 = vpop.f32.mrb[2].mxu0 }
  0xfa   :  { %v421_v58 = vadd.f32 %v1095_v57, %v754_v8  ;;  %v415_v59 = vpop.f32.mrb[3].mxu0 }
  0xfb   :  { %v416_v60 = vadd.f32 %v754_v8, %v415_v59  ;;  %v500_v61 = vpack.c.bf16 %v485_v54, %v484_v56 }
  0xfc   :  { %v487_v62 = vmax.f32 %v421_v58, 0.0 }
  0xfd   :  { %v486_v63 = vmax.f32 %v416_v60, 0.0  ;;  %v1098_v1 = vpop.f32.mrb[4].mxu0  ;;  %1118 = vmatprep.mubr.msk.bf16.mxu1 %vm524_vm0, %v500_v61 }
  0xfe   :  { %v431_v2 = vadd.f32 %v1098_v1, %v754_v8  ;;  %v425_v4 = vpop.f32.mrb[5].mxu0 }
  0xff   :  { %v501_v6 = vpack.c.bf16 %v487_v62, %v486_v63  ;;  %v426_v7 = vadd.f32 %v754_v8, %v425_v4 }
 0x100   :  { %v489_v9 = vmax.f32 %v431_v2, 0.0 }
 0x101   :  { %v488_v10 = vmax.f32 %v426_v7, 0.0  ;;  %v1101_v12 = vpop.f32.mrb[6].mxu0  ;;  %1119 = vmatmul.mubr.msk.bf16.vlgmr.msra.gmra.mrb[0].mxu1 %vm524_vm0, %v501_v6 }
 0x102   :  { %v441_v13 = vadd.f32 %v1101_v12, %v754_v8  ;;  %v435_v14 = vpop.f32.mrb[7].mxu0 }
 0x103   :  { %v502_v15 = vpack.c.bf16 %v489_v9, %v488_v10  ;;  %v436_v16 = vadd.f32 %v754_v8, %v435_v14 }
 0x104   :  { %v491_v17 = vmax.f32 %v441_v13, 0.0 }
 0x105   :  { %v490_v18 = vmax.f32 %v436_v16, 0.0  ;;  %v1104_v19 = vpop.f32.mrb[8].mxu0  ;;  %1122 = vmatprep.mubr.msk.bf16.mxu1 %vm524_vm0, %v502_v15 }
 0x106   :  { %v451_v20 = vadd.f32 %v1104_v19, %v754_v8  ;;  %v445_v21 = vpop.f32.mrb[9].mxu0 }
 0x107   :  { %v503_v22 = vpack.c.bf16 %v491_v17, %v490_v18  ;;  %v446_v24 = vadd.f32 %v754_v8, %v445_v21 }
 0x108   :  { %v493_v25 = vmax.f32 %v451_v20, 0.0 }
 0x109   :  { %v492_v26 = vmax.f32 %v446_v24, 0.0  ;;  %v1107_v27 = vpop.f32.mrb[10].mxu0  ;;  %1123 = vmatmul.mubr.msk.bf16.gmra.mrb[4].mxu1 %vm524_vm0, %v503_v22 }
 0x10a   :  { %v461_v28 = vadd.f32 %v1107_v27, %v754_v8  ;;  %v455_v29 = vpop.f32.mrb[11].mxu0 }
 0x10b   :  { %v504_v30 = vpack.c.bf16 %v493_v25, %v492_v26  ;;  %v456_v31 = vadd.f32 %v754_v8, %v455_v29 }
 0x10c   :  { %v495_v32 = vmax.f32 %v461_v28, 0.0 }
 0x10d   :  { %v494_v33 = vmax.f32 %v456_v31, 0.0  ;;  %v1110_v34 = vpop.f32.mrb[12].mxu0  ;;  %1126 = vmatprep.mubr.msk.bf16.mxu1 %vm524_vm0, %v504_v30 }
 0x10e   :  { %v471_v36 = vadd.f32 %v1110_v34, %v754_v8  ;;  %v465_v37 = vpop.f32.mrb[13].mxu0 }
 0x10f   :  { %v505_v38 = vpack.c.bf16 %v495_v32, %v494_v33  ;;  %v466_v39 = vadd.f32 %v754_v8, %v465_v37 }
 0x110   :  { %v497_v40 = vmax.f32 %v471_v36, 0.0 }
 0x111   :  { %v496_v42 = vmax.f32 %v466_v39, 0.0  ;;  %v1113_v43 = vpop.f32.mrb[14].mxu0  ;;  %1127 = vmatmul.mubr.msk.bf16.gmra.mrb[8].mxu1 %vm524_vm0, %v505_v38 }
 0x112   :  { %v481_v45 = vadd.f32 %v1113_v43, %v754_v8  ;;  %v475_v41 = vpop.f32.mrb[15].mxu0 }
 0x113   :  { %v506_v46 = vpack.c.bf16 %v497_v40, %v496_v42  ;;  %v476_v47 = vadd.f32 %v754_v8, %v475_v41 }
 0x114   :  { %v499_v48 = vmax.f32 %v481_v45, 0.0 }
 0x115   :  { %v498_v55 = vmax.f32 %v476_v47, 0.0  ;;  %1130 = vmatprep.mubr.msk.bf16.mxu1 %vm524_vm0, %v506_v46 }
 0x117   :  { %v507_v49 = vpack.c.bf16 %v499_v48, %v498_v55 }
 0x119   :  { %1131 = vmatmul.mubr.msk.bf16.gmra.mrb[12].mxu1 %vm524_vm0, %v507_v49 }
 0x1d4   :  { %v1120_v3 = vpop.f32.mrb[0].mxu1 }
 0x1d5   :  { %v799_v50 = vpack.c.bf16 %v1120_v3, %v1120_v3  ;;  %v583_v51 = vpop.f32.mrb[1].mxu1 }
 0x1d6   :  { %v797_v52 = vpack.c.bf16 %v583_v51, %v583_v51  ;;  %v1121_v0 = vpop.f32.mrb[2].mxu1 }
 0x1d7   :  { %713 = vst.msk [vmem:[%s1517_s8 + $0x8] sm:$0xf] %vm710_vm1, %v799_v50  ;;  %v800_v5 = vpack.c.bf16 %v1121_v0, %v1121_v0  ;;  %v586_v11 = vpop.f32.mrb[3].mxu1 }
 0x1d8   :  { %711 = vst.msk [vmem:[%s1517_s8] sm:$0xf] %vm710_vm1, %v797_v52  ;;  %v798_v8 = vpack.c.bf16 %v586_v11, %v586_v11 }
 0x1d9   :  { %714 = vst.msk [vmem:[%s1517_s8 + $0xc] sm:$0xf] %vm710_vm1, %v800_v5 }
 0x1da   :  { %712 = vst.msk [vmem:[%s1517_s8 + $0x4] sm:$0xf] %vm710_vm1, %v798_v8 }
 0x1dc   :  { %v1124_v23 = vpop.f32.mrb[4].mxu1 }
 0x1dd   :  { %v803_v35 = vpack.c.bf16 %v1124_v23, %v1124_v23  ;;  %v599_v44 = vpop.f32.mrb[5].mxu1 }
 0x1de   :  { %v801_v53 = vpack.c.bf16 %v599_v44, %v599_v44  ;;  %v1125_v54 = vpop.f32.mrb[6].mxu1 }
 0x1df   :  { %717 = vst.msk [vmem:[%s1517_s8 + $0x18] sm:$0xf] %vm710_vm1, %v803_v35  ;;  %v804_v56 = vpack.c.bf16 %v1125_v54, %v1125_v54  ;;  %v602_v57 = vpop.f32.mrb[7].mxu1 }
 0x1e0   :  { %715 = vst.msk [vmem:[%s1517_s8 + $0x10] sm:$0xf] %vm710_vm1, %v801_v53  ;;  %v802_v58 = vpack.c.bf16 %v602_v57, %v602_v57 }
 0x1e1   :  { %718 = vst.msk [vmem:[%s1517_s8 + $0x1c] sm:$0xf] %vm710_vm1, %v804_v56 }
 0x1e2   :  { %716 = vst.msk [vmem:[%s1517_s8 + $0x14] sm:$0xf] %vm710_vm1, %v802_v58 }
 0x1e4   :  { %v1128_v59 = vpop.f32.mrb[8].mxu1 }
 0x1e5   :  { %v807_v60 = vpack.c.bf16 %v1128_v59, %v1128_v59  ;;  %v615_v61 = vpop.f32.mrb[9].mxu1 }
 0x1e6   :  { %v805_v62 = vpack.c.bf16 %v615_v61, %v615_v61  ;;  %v1129_v63 = vpop.f32.mrb[10].mxu1 }
 0x1e7   :  { %721 = vst.msk [vmem:[%s1517_s8 + $0x28] sm:$0xf] %vm710_vm1, %v807_v60  ;;  %v808_v1 = vpack.c.bf16 %v1129_v63, %v1129_v63  ;;  %v618_v2 = vpop.f32.mrb[11].mxu1 }
 0x1e8   :  { %719 = vst.msk [vmem:[%s1517_s8 + $0x20] sm:$0xf] %vm710_vm1, %v805_v62  ;;  %v806_v4 = vpack.c.bf16 %v618_v2, %v618_v2 }
 0x1e9   :  { %722 = vst.msk [vmem:[%s1517_s8 + $0x2c] sm:$0xf] %vm710_vm1, %v808_v1 }
 0x1ea   :  { %720 = vst.msk [vmem:[%s1517_s8 + $0x24] sm:$0xf] %vm710_vm1, %v806_v4 }
 0x1ec   :  { %v1132_v6 = vpop.f32.mrb[12].mxu1 }
 0x1ed   :  { %v811_v7 = vpack.c.bf16 %v1132_v6, %v1132_v6  ;;  %v631_v9 = vpop.f32.mrb[13].mxu1 }
 0x1ee   :  { %v809_v10 = vpack.c.bf16 %v631_v9, %v631_v9  ;;  %v1133_v12 = vpop.f32.mrb[14].mxu1 }
 0x1ef   :  { %725 = vst.msk [vmem:[%s1517_s8 + $0x38] sm:$0xf] %vm710_vm1, %v811_v7  ;;  %v812_v13 = vpack.c.bf16 %v1133_v12, %v1133_v12  ;;  %v634_v14 = vpop.f32.mrb[15].mxu1 }
 0x1f0   :  { %723 = vst.msk [vmem:[%s1517_s8 + $0x30] sm:$0xf] %vm710_vm1, %v809_v10  ;;  %v810_v15 = vpack.c.bf16 %v634_v14, %v634_v14 }
 0x1f1   :  { %726 = vst.msk [vmem:[%s1517_s8 + $0x3c] sm:$0xf] %vm710_vm1, %v812_v13 }
 0x1f2   :  { %724 = vst.msk [vmem:[%s1517_s8 + $0x34] sm:$0xf] %vm710_vm1, %v810_v15 }

// kernel: gcn_attention_v3_forward.5
= control target key start
LH: loop header
LB: loop body
LE: loop exit
PB: predicated region body
PF: predicated region fallthrough
CT: control target
= control target key end

     0   :  { %vm741_vm0 = vcmask 23552   ;;  %s1721_s4 = inlined_call_operand.vmem [shape: bf16[128,3], index: 4, kind: input, shape index: {}]   ;;  %s1722_s3 = inlined_call_operand.vmem [shape: bf16[128,3], index: 3, kind: input, shape index: {}]   ;;  %s1723_s1 = inlined_call_operand.vmem [shape: bf16[128,128], index: 1, kind: input, shape index: {}]   ;;  %s1724_s0 = inlined_call_operand.vmem [shape: bf16[128,128], index: 0, kind: input, shape index: {}]   ;;  %s1725_s5 = inlined_call_operand.vmem [shape: bf16[128,3], index: 5, kind: input, shape index: {}]   ;;  %s1726_s2 = inlined_call_operand.vmem [shape: bf16[128,128], index: 2, kind: input, shape index: {}]   ;;  %s1727_s6 = inlined_call_operand.vmem [shape: f32[1,3], index: 6, kind: input, shape index: {}]   ;;  %s1728_s7 = inlined_call_operand.vmem [shape: f32[128,3], index: 7, kind: output, shape index: {}]  }
   0x1   :  { %v1179_v0 = vld [vmem:[%s1721_s4] sm:$0xff]   ;;  %v1181_v2 = vld [vmem:[%s1721_s4 + $0x8] sm:$0xff]   ;;  %v1183_v4 = vld [vmem:[%s1721_s4 + $0x10] sm:$0xff]  }
   0x2   :  { %v1180_v1 = vld [vmem:[%s1722_s3] sm:$0xff]   ;;  %1035 = vmatprep.subr.bf16.mxu1 %v1179_v0  ;;  %v1182_v3 = vld [vmem:[%s1722_s3 + $0x8] sm:$0xff]   ;;  %v1184_v5 = vld [vmem:[%s1722_s3 + $0x10] sm:$0xff]  }
   0x3   :  { %1067 = vmatprep.subr.bf16.mxu0 %v1180_v1  ;;  %1036 = vmatpush3.bf16.msra.mxu1 %v1179_v0  ;;  %v1185_v6 = vld [vmem:[%s1721_s4 + $0x18] sm:$0xff]   ;;  %v1187_v8 = vld [vmem:[%s1721_s4 + $0x20] sm:$0xff]   ;;  %v1189_v10 = vld [vmem:[%s1721_s4 + $0x28] sm:$0xff]  }
   0x4   :  { %1068 = vmatpush3.bf16.msra.mxu0 %v1180_v1  ;;  %1037 = vmatprep.subr.bf16.mxu1 %v1181_v2  ;;  %v1186_v7 = vld [vmem:[%s1722_s3 + $0x18] sm:$0xff]   ;;  %v1188_v9 = vld [vmem:[%s1722_s3 + $0x20] sm:$0xff]   ;;  %v1190_v11 = vld [vmem:[%s1722_s3 + $0x28] sm:$0xff]  }
   0x5   :  { %1069 = vmatprep.subr.bf16.mxu0 %v1182_v3  ;;  %v1195_v12 = vld [vmem:[%s1723_s1] sm:$0xff]   ;;  %v1191_v14 = vld [vmem:[%s1721_s4 + $0x30] sm:$0xff]   ;;  %v1193_v16 = vld [vmem:[%s1721_s4 + $0x38] sm:$0xff]  }
   0x6   :  { %v1196_v13 = vld [vmem:[%s1724_s0] sm:$0xff]   ;;  %1051 = vmatprep.mubr.bf16.mxu1 %v1195_v12  ;;  %v1192_v15 = vld [vmem:[%s1722_s3 + $0x30] sm:$0xff]   ;;  %v1194_v17 = vld [vmem:[%s1722_s3 + $0x38] sm:$0xff]  }
   0x7   :  { %1038 = vmatpush3.bf16.msra.mxu1 %v1181_v2  ;;  %1083 = vmatprep.mubr.bf16.mxu0 %v1196_v13  ;;  %v1199_v18 = vld [vmem:[%s1725_s5] sm:$0xff]   ;;  %v1197_v19 = vld [vmem:[%s1723_s1 + $0x8] sm:$0xff]   ;;  %v1201_v22 = vld [vmem:[%s1723_s1 + $0x10] sm:$0xff]  }
   0x8   :  { %1070 = vmatpush3.bf16.msra.mxu0 %v1182_v3  ;;  %1039 = vmatprep.subr.bf16.mxu1 %v1183_v4  ;;  %v1198_v20 = vld [vmem:[%s1724_s0 + $0x8] sm:$0xff]   ;;  %v1202_v23 = vld [vmem:[%s1724_s0 + $0x10] sm:$0xff]   ;;  %v1203_v25 = vld [vmem:[%s1723_s1 + $0x18] sm:$0xff]  }
   0x9   :  { %1071 = vmatprep.subr.bf16.mxu0 %v1184_v5  ;;  %v1200_v21 = vld [vmem:[%s1725_s5 + $0x8] sm:$0xff]   ;;  %v1205_v24 = vld [vmem:[%s1725_s5 + $0x10] sm:$0xff]   ;;  %v1204_v26 = vld [vmem:[%s1724_s0 + $0x18] sm:$0xff]  }
   0xa   :  { %v1206_v27 = vld [vmem:[%s1725_s5 + $0x18] sm:$0xff]   ;;  %v1207_v28 = vld [vmem:[%s1723_s1 + $0x20] sm:$0xff]   ;;  %v1209_v31 = vld [vmem:[%s1723_s1 + $0x28] sm:$0xff]  }
   0xb   :  { %1040 = vmatpush3.bf16.msra.mxu1 %v1183_v4  ;;  %v1208_v29 = vld [vmem:[%s1724_s0 + $0x20] sm:$0xff]   ;;  %v1210_v32 = vld [vmem:[%s1724_s0 + $0x28] sm:$0xff]   ;;  %v1213_v34 = vld [vmem:[%s1723_s1 + $0x30] sm:$0xff]  }
   0xc   :  { %1072 = vmatpush3.bf16.msra.mxu0 %v1184_v5  ;;  %1041 = vmatprep.subr.bf16.mxu1 %v1185_v6  ;;  %v1211_v30 = vld [vmem:[%s1725_s5 + $0x20] sm:$0xff]   ;;  %v1212_v33 = vld [vmem:[%s1725_s5 + $0x28] sm:$0xff]   ;;  %v1214_v35 = vld [vmem:[%s1724_s0 + $0x30] sm:$0xff]  }
   0xd   :  { %1073 = vmatprep.subr.bf16.mxu0 %v1186_v7  ;;  %v1217_v36 = vld [vmem:[%s1725_s5 + $0x30] sm:$0xff]   ;;  %v1215_v37 = vld [vmem:[%s1723_s1 + $0x38] sm:$0xff]   ;;  %v1219_v40 = vld [vmem:[%s1726_s2] sm:$0xff]  }
   0xe   :  { %v1216_v38 = vld [vmem:[%s1724_s0 + $0x38] sm:$0xff]   ;;  %v1220_v41 = vld [vmem:[%s1726_s2 + $0x20] sm:$0xff]   ;;  %v1222_v42 = vld [vmem:[%s1726_s2 + $0x28] sm:$0xff]  }
   0xf   :  { %1042 = vmatpush3.bf16.msra.mxu1 %v1185_v6  ;;  %v1218_v39 = vld [vmem:[%s1725_s5 + $0x38] sm:$0xff]   ;;  %v1221_v43 = vld [vmem:[%s1726_s2 + $0x8] sm:$0xff]   ;;  %v1224_v44 = vld [vmem:[%s1726_s2 + $0x30] sm:$0xff]  }
  0x10   :  { %1074 = vmatpush3.bf16.msra.mxu0 %v1186_v7  ;;  %1043 = vmatprep.subr.bf16.mxu1 %v1187_v8  ;;  %v1223_v45 = vld [vmem:[%s1726_s2 + $0x10] sm:$0xff]   ;;  %v1226_v46 = vld [vmem:[%s1726_s2 + $0x38] sm:$0xff]  }
  0x11   :  { %1075 = vmatprep.subr.bf16.mxu0 %v1188_v9  ;;  %v1225_v47 = vld [vmem:[%s1726_s2 + $0x18] sm:$0xff]  }
  0x13   :  { %1044 = vmatpush3.bf16.msra.mxu1 %v1187_v8 }
  0x14   :  { %1076 = vmatpush3.bf16.msra.mxu0 %v1188_v9  ;;  %1045 = vmatprep.subr.bf16.mxu1 %v1189_v10 }
  0x15   :  { %1077 = vmatprep.subr.bf16.mxu0 %v1190_v11 }
  0x17   :  { %1046 = vmatpush3.bf16.msra.mxu1 %v1189_v10 }
  0x18   :  { %1078 = vmatpush3.bf16.msra.mxu0 %v1190_v11  ;;  %1047 = vmatprep.subr.bf16.mxu1 %v1191_v14 }
  0x19   :  { %1079 = vmatprep.subr.bf16.mxu0 %v1192_v15 }
  0x1b   :  { %1048 = vmatpush3.bf16.msra.mxu1 %v1191_v14 }
  0x1c   :  { %1080 = vmatpush3.bf16.msra.mxu0 %v1192_v15  ;;  %1049 = vmatprep.subr.bf16.mxu1 %v1193_v16 }
  0x1d   :  { %1081 = vmatprep.subr.bf16.mxu0 %v1194_v17 }
  0x1f   :  { %1050 = vmatpush3.bf16.msra.mxu1 %v1193_v16 }
  0x20   :  { %1082 = vmatpush3.bf16.msra.mxu0 %v1194_v17  ;;  %1131 = vmatprep.subr.bf16.mxu1 %v1199_v18  ;;  %v1484_v17 = vld [vmem:[%s1727_s6] ss:$0 sm:$0xff] }
  0x21   :  { %1099 = vmatprep.subr.bf16.mxu0 %v1199_v18 }
  0x22   :  { %1052 = vmatmul.mubr.bf16.vlgmr.msra.gmra.mrb[0].mxu1 %v1197_v19 }
  0x23   :  { %1084 = vmatmul.mubr.bf16.vlgmr.msra.gmra.mrb[0].mxu0 %v1198_v20  ;;  %1139 = vmatpush3.bf16.msra.mxu1 %v1199_v18 }
  0x24   :  { %1100 = vmatpush3.bf16.msra.mxu0 %v1199_v18  ;;  %1132 = vmatprep.subr.bf16.mxu1 %v1200_v21 }
  0x25   :  { %1101 = vmatprep.subr.bf16.mxu0 %v1200_v21  ;;  %1055 = vmatprep.mubr.bf16.mxu1 %v1201_v22 }
  0x26   :  { %1087 = vmatprep.mubr.bf16.mxu0 %v1202_v23 }
  0x27   :  { %1140 = vmatpush3.bf16.msra.mxu1 %v1200_v21 }
  0x28   :  { %1102 = vmatpush3.bf16.msra.mxu0 %v1200_v21  ;;  %1133 = vmatprep.subr.bf16.mxu1 %v1205_v24 }
  0x29   :  { %1103 = vmatprep.subr.bf16.mxu0 %v1205_v24 }
  0x2a   :  { %1056 = vmatmul.mubr.bf16.gmra.mrb[4].mxu1 %v1203_v25 }
  0x2b   :  { %1088 = vmatmul.mubr.bf16.gmra.mrb[4].mxu0 %v1204_v26  ;;  %1141 = vmatpush3.bf16.msra.mxu1 %v1205_v24 }
  0x2c   :  { %1104 = vmatpush3.bf16.msra.mxu0 %v1205_v24  ;;  %1134 = vmatprep.subr.bf16.mxu1 %v1206_v27 }
  0x2d   :  { %1105 = vmatprep.subr.bf16.mxu0 %v1206_v27  ;;  %1059 = vmatprep.mubr.bf16.mxu1 %v1207_v28 }
  0x2e   :  { %1091 = vmatprep.mubr.bf16.mxu0 %v1208_v29 }
  0x2f   :  { %1142 = vmatpush3.bf16.msra.mxu1 %v1206_v27 }
  0x30   :  { %1106 = vmatpush3.bf16.msra.mxu0 %v1206_v27  ;;  %1135 = vmatprep.subr.bf16.mxu1 %v1211_v30 }
  0x31   :  { %1107 = vmatprep.subr.bf16.mxu0 %v1211_v30 }
  0x32   :  { %1060 = vmatmul.mubr.bf16.gmra.mrb[8].mxu1 %v1209_v31 }
  0x33   :  { %1092 = vmatmul.mubr.bf16.gmra.mrb[8].mxu0 %v1210_v32  ;;  %1143 = vmatpush3.bf16.msra.mxu1 %v1211_v30 }
  0x34   :  { %1108 = vmatpush3.bf16.msra.mxu0 %v1211_v30  ;;  %1136 = vmatprep.subr.bf16.mxu1 %v1212_v33 }
  0x35   :  { %1109 = vmatprep.subr.bf16.mxu0 %v1212_v33  ;;  %1063 = vmatprep.mubr.bf16.mxu1 %v1213_v34 }
  0x36   :  { %1095 = vmatprep.mubr.bf16.mxu0 %v1214_v35 }
  0x37   :  { %1144 = vmatpush3.bf16.msra.mxu1 %v1212_v33 }
  0x38   :  { %1110 = vmatpush3.bf16.msra.mxu0 %v1212_v33  ;;  %1137 = vmatprep.subr.bf16.mxu1 %v1217_v36 }
  0x39   :  { %1111 = vmatprep.subr.bf16.mxu0 %v1217_v36 }
  0x3a   :  { %1064 = vmatmul.mubr.bf16.gmra.mrb[12].mxu1 %v1215_v37 }
  0x3b   :  { %1096 = vmatmul.mubr.bf16.gmra.mrb[12].mxu0 %v1216_v38  ;;  %1145 = vmatpush3.bf16.msra.mxu1 %v1217_v36 }
  0x3c   :  { %1112 = vmatpush3.bf16.msra.mxu0 %v1217_v36  ;;  %1138 = vmatprep.subr.bf16.mxu1 %v1218_v39 }
  0x3d   :  { %1113 = vmatprep.subr.bf16.mxu0 %v1218_v39  ;;  %1115 = vmatprep.mubr.bf16.mxu0 %v1219_v40 }
  0x3e   :  { %1123 = vmatprep.mubr.bf16.mxu1 %v1220_v41 }
  0x3f   :  { %1146 = vmatpush3.bf16.msra.mxu1 %v1218_v39 }
  0x40   :  { %1114 = vmatpush3.bf16.msra.mxu0 %v1218_v39 }
  0x42   :  { %1124 = vmatmul.mubr.bf16.vlgmr.msra.gmra.mrb[16].mxu1 %v1222_v42 }
  0x43   :  { %1116 = vmatmul.mubr.bf16.vlgmr.msra.gmra.mrb[0].mxu0 %v1221_v43  ;;  %1127 = vmatprep.mubr.bf16.mxu1 %v1224_v44 }
  0x44   :  { %1119 = vmatprep.mubr.bf16.mxu0 %v1223_v45 }
  0x4a   :  { %1128 = vmatmul.mubr.bf16.gmra.mrb[20].mxu1 %v1226_v46 }
  0x4b   :  { %1120 = vmatmul.mubr.bf16.gmra.mrb[4].mxu0 %v1225_v47 }
  0xf5   :  { %v1053_v48 = vpop.f32.mrb[0].mxu1 }
  0xf6   :  { %v221_v49 = vpop.f32.mrb[1].mxu1 }
  0xf7   :  { %v1054_v50 = vpop.f32.mrb[2].mxu1 }
  0xf8   :  { %v224_v51 = vpop.f32.mrb[3].mxu1 }
  0xfd   :  { %v1057_v52 = vpop.f32.mrb[4].mxu1 }
  0xfe   :  { %v1475_v53 = vpop.f32.mrb[5].mxu1 }
  0xff   :  { %v1477_v54 = vpop.f32.mrb[6].mxu1 }
 0x100   :  { %v1479_v55 = vpop.f32.mrb[7].mxu1 }
 0x105   :  { %v1061_v56 = vpop.f32.mrb[8].mxu1 }
 0x106   :  { %v1093_v57 = vpop.f32.mrb[8].mxu0  ;;  %v253_v58 = vpop.f32.mrb[9].mxu1 }
 0x107   :  { %v455_v59 = vadd.f32 %v1093_v57, %v1061_v56  ;;  %v446_v60 = vpop.f32.mrb[9].mxu0  ;;  %v1062_v61 = vpop.f32.mrb[10].mxu1 }
 0x108   :  { %v447_v62 = vadd.f32 %v446_v60, %v253_v58  ;;  %v1094_v63 = vpop.f32.mrb[10].mxu0  ;;  %v256_v0 = vpop.f32.mrb[11].mxu1 }
 0x109   :  { %v458_v1 = vadd.f32 %v1094_v63, %v1062_v61  ;;  %v449_v2 = vpop.f32.mrb[11].mxu0 }
 0x10a   :  { %v450_v3 = vadd.f32 %v449_v2, %v256_v0 }
 0x10d   :  { %v1065_v4 = vpop.f32.mrb[12].mxu1 }
 0x10e   :  { %v1097_v5 = vpop.f32.mrb[12].mxu0  ;;  %v269_v6 = vpop.f32.mrb[13].mxu1 }
 0x10f   :  { %v471_v7 = vadd.f32 %v1097_v5, %v1065_v4  ;;  %v462_v8 = vpop.f32.mrb[13].mxu0  ;;  %v1066_v9 = vpop.f32.mrb[14].mxu1 }
 0x110   :  { %v463_v10 = vadd.f32 %v462_v8, %v269_v6  ;;  %v1098_v11 = vpop.f32.mrb[14].mxu0  ;;  %v272_v12 = vpop.f32.mrb[15].mxu1 }
 0x111   :  { %v474_v13 = vadd.f32 %v1098_v11, %v1066_v9  ;;  %v465_v14 = vpop.f32.mrb[15].mxu0 }
 0x112   :  { %v466_v15 = vadd.f32 %v465_v14, %v272_v12 }
 0x115   :  { %v1125_v16 = vpop.f32.mrb[16].mxu1 }
 0x116   :  { %v1117_v18 = vpop.f32.mrb[0].mxu0  ;;  %v712_v19 = vadd.f32 %v1125_v16, %v455_v59  ;;  %v671_v20 = vpop.f32.mrb[17].mxu1 }
 0x117   :  { %v1147_v21 = vadd.f32 %v1117_v18, %v1053_v48  ;;  %v639_v22 = vpop.f32.mrb[1].mxu0  ;;  %v710_v23 = vadd.f32 %v671_v20, %v447_v62  ;;  %v1126_v24 = vpop.f32.mrb[18].mxu1 }
 0x118   :  { %v1148_v25 = vadd.f32 %v639_v22, %v221_v49  ;;  %v1118_v26 = vpop.f32.mrb[2].mxu0  ;;  %v713_v27 = vadd.f32 %v1126_v24, %v458_v1  ;;  %v674_v28 = vpop.f32.mrb[19].mxu1  ;;  %v1487_v29 = vadd.f32 %v1484_v17, %v712_v19 }
 0x119   :  { %v1149_v30 = vadd.f32 %v1118_v26, %v1054_v50  ;;  %v642_v31 = vpop.f32.mrb[3].mxu0  ;;  %v711_v32 = vadd.f32 %v674_v28, %v450_v3  ;;  %v1490_v33 = vadd.f32 %v1147_v21, %v1484_v17  ;;  %v1505_v44 = vadd.f32 %v1484_v17, %v710_v23 }
 0x11a   :  { %v1150_v34 = vadd.f32 %v642_v31, %v224_v51  ;;  %v772_v35 = vsel %vm741_vm0, %v1487_v29, -inf  ;;  %v1495_v36 = vadd.f32 %v1148_v25, %v1484_v17  ;;  %v1510_v50 = vadd.f32 %v1484_v17, %v713_v27 }
 0x11b   :  { %773 = vmax.xlane.f32.xlu0 %v772_v35  ;;  %v748_v37 = vsel %vm741_vm0, %v1490_v33, -inf  ;;  %v1500_v38 = vadd.f32 %v1149_v30, %v1484_v17  ;;  %v766_v62 = vsel %vm741_vm0, %v1505_v44, -inf }
 0x11c   :  { %749 = vmax.xlane.f32.xlu1 %v748_v37  ;;  %v742_v43 = vsel %vm741_vm0, %v1495_v36, -inf  ;;  %v726_v63 = vadd.f32 %v1150_v34, %v1484_v17  ;;  %v775_v0 = vsel %vm741_vm0, %v1510_v50, -inf }
 0x11d   :  { %v1129_v39 = vpop.f32.mrb[20].mxu1  ;;  %v751_v49 = vsel %vm741_vm0, %v1500_v38, -inf }
 0x11e   :  { %v1121_v40 = vpop.f32.mrb[4].mxu0  ;;  %v716_v41 = vadd.f32 %v1129_v39, %v471_v7  ;;  %v687_v42 = vpop.f32.mrb[21].mxu1  ;;  %v745_v1 = vsel %vm741_vm0, %v726_v63, -inf }
 0x11f   :  { %v1151_v45 = vadd.f32 %v1121_v40, %v1057_v52  ;;  %v655_v46 = vpop.f32.mrb[5].mxu0  ;;  %v714_v47 = vadd.f32 %v687_v42, %v463_v10  ;;  %v1130_v48 = vpop.f32.mrb[22].mxu1  ;;  %743 = vmax.xlane.f32.xlu0 %v742_v43 }
 0x120   :  { %v1152_v51 = vadd.f32 %v655_v46, %v1475_v53  ;;  %v717_v56 = vadd.f32 %v1130_v48, %v474_v13  ;;  %752 = vmax.xlane.f32.xlu1 %v751_v49  ;;  %v1122_v57 = vpop.f32.mrb[6].mxu0  ;;  %v690_v58 = vpop.f32.mrb[23].mxu1  ;;  %v734_v53 = vadd.f32 %v1484_v17, %v711_v32  ;;  %v1552_v12 = vadd.f32 %v1484_v17, %v716_v41 }
 0x121   :  { %v1153_v59 = vadd.f32 %v1122_v57, %v1477_v54  ;;  %v658_v60 = vpop.f32.mrb[7].mxu0  ;;  %v715_v52 = vadd.f32 %v690_v58, %v466_v15  ;;  %v1523_v54 = vadd.f32 %v1151_v45, %v1484_v17  ;;  %v1542_v8 = vadd.f32 %v1484_v17, %v714_v47 }
 0x122   :  { %v1154_v61 = vadd.f32 %v658_v60, %v1479_v55  ;;  %v769_v2 = vsel %vm741_vm0, %v734_v53, -inf  ;;  %v1532_v4 = vadd.f32 %v1152_v51, %v1484_v17  ;;  %v1557_v14 = vadd.f32 %v1484_v17, %v717_v56 }
 0x123   :  { %767 = vmax.xlane.f32.xlu0 %v766_v62  ;;  %v1527_v55 = vadd.f32 %v1153_v59, %v1484_v17  ;;  %v760_v3 = vsel %vm741_vm0, %v1523_v54, -inf  ;;  %v1547_v10 = vadd.f32 %v1484_v17, %v715_v52  ;;  %v778_v11 = vsel %vm741_vm0, %v1542_v8, -inf }
 0x124   :  { %776 = vmax.xlane.f32.xlu1 %v775_v0  ;;  %v1537_v6 = vadd.f32 %v1154_v61, %v1484_v17  ;;  %v754_v7 = vsel %vm741_vm0, %v1532_v4, -inf  ;;  %v784_v15 = vsel %vm741_vm0, %v1552_v12, -inf  ;;  %v787_v16 = vsel %vm741_vm0, %v1557_v14, -inf }
 0x125   :  { %v763_v5 = vsel %vm741_vm0, %v1527_v55, -inf  ;;  %v781_v13 = vsel %vm741_vm0, %v1547_v10, -inf }
 0x126   :  { %v757_v9 = vsel %vm741_vm0, %v1537_v6, -inf }
 0x127   :  { %746 = vmax.xlane.f32.xlu0 %v745_v1 }
 0x128   :  { %770 = vmax.xlane.f32.xlu1 %v769_v2 }
 0x12b   :  { %761 = vmax.xlane.f32.xlu0 %v760_v3 }
 0x12c   :  { %764 = vmax.xlane.f32.xlu1 %v763_v5 }
 0x12f   :  { %755 = vmax.xlane.f32.xlu0 %v754_v7 }
 0x130   :  { %758 = vmax.xlane.f32.xlu1 %v757_v9 }
 0x133   :  { %779 = vmax.xlane.f32.xlu0 %v778_v11 }
 0x134   :  { %782 = vmax.xlane.f32.xlu1 %v781_v13 }
 0x137   :  { %785 = vmax.xlane.f32.xlu0 %v784_v15 }
 0x138   :  { %788 = vmax.xlane.f32.xlu1 %v787_v16 }
 0x1a8   :  { %v774_v18 = vpop.xlane.xlu0 %773 }
 0x1a9   :  { %v800_v19 = vsub.f32 %v1487_v29, %v774_v18  ;;  %v750_v20 = vpop.xlane.xlu1 %749 }
 0x1aa   :  { %v792_v21 = vsub.f32 %v1490_v33, %v750_v20 }
 0x1ab   :  { %v826_v22 = vmul.f32 1.442695, %v800_v19 }
 0x1ac   :  { %v810_v23 = vmul.f32 1.442695, %v792_v21  ;;  %v744_v24 = vpop.xlane.xlu0 %743 }
 0x1ad   :  { %v790_v17 = vsub.f32 %v1495_v36, %v744_v24  ;;  %v753_v25 = vpop.xlane.xlu1 %752 }
 0x1ae   :  { %1227 = vpow2.f32 %v810_v23  ;;  %v793_v26 = vsub.f32 %v1500_v38, %v753_v25 }
 0x1af   :  { %1229 = vpow2.f32 %v826_v22  ;;  %v806_v27 = vmul.f32 1.442695, %v790_v17 }
 0x1b0   :  { %v812_v28 = vmul.f32 1.442695, %v793_v26  ;;  %v768_v30 = vpop.xlane.xlu0 %767 }
 0x1b1   :  { %v777_v31 = vpop.xlane.xlu1 %776  ;;  %v798_v32 = vsub.f32 %v1505_v44, %v768_v30 }
 0x1b2   :  { %1231 = vpow2.f32 %v812_v28  ;;  %v801_v29 = vsub.f32 %v1510_v50, %v777_v31 }
 0x1b3   :  { %1233 = vpow2.f32 %v806_v27  ;;  %v822_v34 = vmul.f32 1.442695, %v798_v32 }
 0x1b4   :  { %v828_v33 = vmul.f32 1.442695, %v801_v29  ;;  %v747_v35 = vpop.xlane.xlu0 %746 }
 0x1b5   :  { %v771_v37 = vpop.xlane.xlu1 %770  ;;  %v791_v36 = vsub.f32 %v726_v63, %v747_v35 }
 0x1b6   :  { %1235 = vpow2.f32 %v828_v33  ;;  %v799_v39 = vsub.f32 %v734_v53, %v771_v37 }
 0x1b7   :  { %v808_v40 = vmul.f32 1.442695, %v791_v36  ;;  %1237 = vpow2.f32 %v822_v34 }
 0x1b8   :  { %v1569_v38 = vpop.eup %1227  ;;  %v824_v41 = vmul.f32 1.442695, %v799_v39  ;;  %v762_v42 = vpop.xlane.xlu0 %761 }
 0x1b9   :  { %1239 = vpow2.f32 %v808_v40  ;;  %v765_v43 = vpop.xlane.xlu1 %764  ;;  %v796_v44 = vsub.f32 %v1523_v54, %v762_v42  ;;  %v844_v45 = vsel %vm741_vm0, %v1569_v38, 0.0  ;;  %v1574_v46 = vpop.eup %1229 }
 0x1ba   :  { %v797_v47 = vsub.f32 %v1527_v55, %v765_v43  ;;  %845 = vadd.xlane.f32.xlu0 %v844_v45  ;;  %1241 = vpow2.f32 %v824_v41  ;;  %v868_v59 = vsel %vm741_vm0, %v1574_v46, 0.0 }
 0x1bb   :  { %v818_v48 = vmul.f32 1.442695, %v796_v44 }
 0x1bc   :  { %v1577_v49 = vpop.eup %1231  ;;  %v820_v50 = vmul.f32 1.442695, %v797_v47  ;;  %v756_v51 = vpop.xlane.xlu0 %755 }
 0x1bd   :  { %1243 = vpow2.f32 %v818_v48  ;;  %v759_v56 = vpop.xlane.xlu1 %758  ;;  %v794_v57 = vsub.f32 %v1532_v4, %v756_v51  ;;  %v847_v58 = vsel %vm741_vm0, %v1577_v49, 0.0  ;;  %v1584_v60 = vpop.eup %1233 }
 0x1be   :  { %v795_v52 = vsub.f32 %v1537_v6, %v759_v56  ;;  %848 = vadd.xlane.f32.xlu1 %v847_v58  ;;  %869 = vadd.xlane.f32.xlu0 %v868_v59  ;;  %1245 = vpow2.f32 %v820_v50  ;;  %v838_v2 = vsel %vm741_vm0, %v1584_v60, 0.0 }
 0x1bf   :  { %v814_v61 = vmul.f32 1.442695, %v794_v57 }
 0x1c0   :  { %v1587_v62 = vpop.eup %1235  ;;  %v816_v63 = vmul.f32 1.442695, %v795_v52  ;;  %v780_v0 = vpop.xlane.xlu0 %779 }
 0x1c1   :  { %1247 = vpow2.f32 %v814_v61  ;;  %v783_v53 = vpop.xlane.xlu1 %782  ;;  %v802_v1 = vsub.f32 %v1542_v8, %v780_v0  ;;  %v871_v54 = vsel %vm741_vm0, %v1587_v62, 0.0  ;;  %v1594_v55 = vpop.eup %1237 }
 0x1c2   :  { %v803_v3 = vsub.f32 %v1547_v10, %v783_v53  ;;  %872 = vadd.xlane.f32.xlu1 %v871_v54  ;;  %839 = vadd.xlane.f32.xlu0 %v838_v2  ;;  %1249 = vpow2.f32 %v816_v63  ;;  %v862_v13 = vsel %vm741_vm0, %v1594_v55, 0.0 }
 0x1c3   :  { %v1597_v4 = vpop.eup %1239  ;;  %v830_v5 = vmul.f32 1.442695, %v802_v1 }
 0x1c4   :  { %v832_v6 = vmul.f32 1.442695, %v803_v3  ;;  %v786_v7 = vpop.xlane.xlu0 %785  ;;  %v841_v8 = vsel %vm741_vm0, %v1597_v4, 0.0  ;;  %v1604_v15 = vpop.eup %1241 }
 0x1c5   :  { %1251 = vpow2.f32 %v830_v5  ;;  %v789_v9 = vpop.xlane.xlu1 %788  ;;  %v804_v11 = vsub.f32 %v1552_v12, %v786_v7  ;;  %v865_v12 = vsel %vm741_vm0, %v1604_v15, 0.0 }
 0x1c6   :  { %v805_v10 = vsub.f32 %v1557_v14, %v789_v9  ;;  %863 = vadd.xlane.f32.xlu0 %v862_v13  ;;  %842 = vadd.xlane.f32.xlu1 %v841_v8  ;;  %1253 = vpow2.f32 %v832_v6 }
 0x1c7   :  { %v1607_v16 = vpop.eup %1243  ;;  %v834_v18 = vmul.f32 1.442695, %v804_v11 }
 0x1c8   :  { %v836_v19 = vmul.f32 1.442695, %v805_v10  ;;  %v856_v20 = vsel %vm741_vm0, %v1607_v16, 0.0  ;;  %v1613_v21 = vpop.eup %1245 }
 0x1c9   :  { %1255 = vpow2.f32 %v834_v18  ;;  %v859_v23 = vsel %vm741_vm0, %v1613_v21, 0.0 }
 0x1ca   :  { %866 = vadd.xlane.f32.xlu1 %v865_v12  ;;  %857 = vadd.xlane.f32.xlu0 %v856_v20  ;;  %1257 = vpow2.f32 %v836_v19 }
 0x1cb   :  { %v1615_v22 = vpop.eup %1247 }
 0x1cc   :  { %v850_v14 = vsel %vm741_vm0, %v1615_v22, 0.0  ;;  %v1621_v24 = vpop.eup %1249 }
 0x1cd   :  { %v853_v26 = vsel %vm741_vm0, %v1621_v24, 0.0 }
 0x1ce   :  { %860 = vadd.xlane.f32.xlu1 %v859_v23  ;;  %851 = vadd.xlane.f32.xlu0 %v850_v14 }
 0x1cf   :  { %v1623_v17 = vpop.eup %1251 }
 0x1d0   :  { %v874_v25 = vsel %vm741_vm0, %v1623_v17, 0.0  ;;  %v1629_v27 = vpop.eup %1253 }
 0x1d1   :  { %v877_v31 = vsel %vm741_vm0, %v1629_v27, 0.0 }
 0x1d2   :  { %854 = vadd.xlane.f32.xlu1 %v853_v26  ;;  %875 = vadd.xlane.f32.xlu0 %v874_v25 }
 0x1d3   :  { %v1631_v28 = vpop.eup %1255 }
 0x1d4   :  { %v880_v30 = vsel %vm741_vm0, %v1631_v28, 0.0  ;;  %v1637_v32 = vpop.eup %1257 }
 0x1d5   :  { %v883_v29 = vsel %vm741_vm0, %v1637_v32, 0.0 }
 0x1d6   :  { %878 = vadd.xlane.f32.xlu1 %v877_v31  ;;  %881 = vadd.xlane.f32.xlu0 %v880_v30 }
 0x1da   :  { %884 = vadd.xlane.f32.xlu1 %v883_v29 }
 0x247   :  { %v846_v33 = vpop.xlane.xlu0 %845 }
 0x248   :  { %1259 = vrcp.f32 %v846_v33 }
 0x24b   :  { %v849_v34 = vpop.xlane.xlu1 %848  ;;  %v870_v35 = vpop.xlane.xlu0 %869 }
 0x24c   :  { %1261 = vrcp.f32 %v849_v34 }
 0x24d   :  { %1263 = vrcp.f32 %v870_v35 }
 0x24f   :  { %v873_v37 = vpop.xlane.xlu1 %872  ;;  %v840_v36 = vpop.xlane.xlu0 %839 }
 0x250   :  { %1265 = vrcp.f32 %v873_v37 }
 0x251   :  { %1267 = vrcp.f32 %v840_v36 }
 0x252   :  { %v1260_v39 = vpop.eup %1259 }
 0x253   :  { %v904_v40 = vmul.f32 %v1260_v39, %v1569_v38  ;;  %v843_v41 = vpop.xlane.xlu1 %842  ;;  %v864_v42 = vpop.xlane.xlu0 %863 }
 0x254   :  { %1269 = vrcp.f32 %v843_v41 }
 0x255   :  { %920 = vst.msk [vmem:[%s1728_s7 + $0x10] sm:$0xff] %vm741_vm0, %v904_v40  ;;  %1271 = vrcp.f32 %v864_v42 }
 0x256   :  { %v1262_v43 = vpop.eup %1261 }
 0x257   :  { %v1264_v44 = vpop.eup %1263  ;;  %v905_v45 = vmul.f32 %v1262_v43, %v1577_v49  ;;  %v867_v47 = vpop.xlane.xlu1 %866 }
 0x258   :  { %v858_v48 = vpop.xlane.xlu0 %857  ;;  %v912_v50 = vmul.f32 %v1264_v44, %v1574_v46  ;;  %1273 = vrcp.f32 %v867_v47 }
 0x259   :  { %921 = vst.msk [vmem:[%s1728_s7 + $0x18] sm:$0xff] %vm741_vm0, %v905_v45  ;;  %1275 = vrcp.f32 %v858_v48 }
 0x25a   :  { %v1266_v38 = vpop.eup %1265  ;;  %928 = vst.msk [vmem:[%s1728_s7 + $0x50] sm:$0xff] %vm741_vm0, %v912_v50 }
 0x25b   :  { %v1268_v51 = vpop.eup %1267  ;;  %v913_v49 = vmul.f32 %v1266_v38, %v1587_v62  ;;  %v861_v56 = vpop.xlane.xlu1 %860 }
 0x25c   :  { %v852_v57 = vpop.xlane.xlu0 %851  ;;  %v902_v46 = vmul.f32 %v1268_v51, %v1584_v60  ;;  %1277 = vrcp.f32 %v861_v56 }
 0x25d   :  { %929 = vst.msk [vmem:[%s1728_s7 + $0x58] sm:$0xff] %vm741_vm0, %v913_v49  ;;  %1279 = vrcp.f32 %v852_v57 }
 0x25e   :  { %v1270_v58 = vpop.eup %1269  ;;  %918 = vst.msk [vmem:[%s1728_s7] sm:$0xff] %vm741_vm0, %v902_v46 }
 0x25f   :  { %v1272_v59 = vpop.eup %1271  ;;  %v903_v52 = vmul.f32 %v1270_v58, %v1597_v4  ;;  %v855_v61 = vpop.xlane.xlu1 %854 }
 0x260   :  { %v876_v62 = vpop.xlane.xlu0 %875  ;;  %v910_v60 = vmul.f32 %v1272_v59, %v1594_v55  ;;  %1281 = vrcp.f32 %v855_v61 }
 0x261   :  { %919 = vst.msk [vmem:[%s1728_s7 + $0x8] sm:$0xff] %vm741_vm0, %v903_v52  ;;  %1283 = vrcp.f32 %v876_v62 }
 0x262   :  { %v1274_v63 = vpop.eup %1273  ;;  %926 = vst.msk [vmem:[%s1728_s7 + $0x40] sm:$0xff] %vm741_vm0, %v910_v60 }
 0x263   :  { %v1276_v0 = vpop.eup %1275  ;;  %v911_v53 = vmul.f32 %v1274_v63, %v1604_v15  ;;  %v879_v1 = vpop.xlane.xlu1 %878 }
 0x264   :  { %v882_v54 = vpop.xlane.xlu0 %881  ;;  %v908_v2 = vmul.f32 %v1276_v0, %v1607_v16  ;;  %1285 = vrcp.f32 %v879_v1 }
 0x265   :  { %927 = vst.msk [vmem:[%s1728_s7 + $0x48] sm:$0xff] %vm741_vm0, %v911_v53  ;;  %1287 = vrcp.f32 %v882_v54 }
 0x266   :  { %v1278_v55 = vpop.eup %1277  ;;  %924 = vst.msk [vmem:[%s1728_s7 + $0x30] sm:$0xff] %vm741_vm0, %v908_v2 }
 0x267   :  { %v1280_v3 = vpop.eup %1279  ;;  %v909_v4 = vmul.f32 %v1278_v55, %v1613_v21  ;;  %v885_v5 = vpop.xlane.xlu1 %884 }
 0x268   :  { %v906_v6 = vmul.f32 %v1280_v3, %v1615_v22  ;;  %1289 = vrcp.f32 %v885_v5 }
 0x269   :  { %925 = vst.msk [vmem:[%s1728_s7 + $0x38] sm:$0xff] %vm741_vm0, %v909_v4 }
 0x26a   :  { %v1282_v7 = vpop.eup %1281  ;;  %922 = vst.msk [vmem:[%s1728_s7 + $0x20] sm:$0xff] %vm741_vm0, %v906_v6 }
 0x26b   :  { %v1284_v8 = vpop.eup %1283  ;;  %v907_v9 = vmul.f32 %v1282_v7, %v1621_v24 }
 0x26c   :  { %v914_v11 = vmul.f32 %v1284_v8, %v1623_v17 }
 0x26d   :  { %923 = vst.msk [vmem:[%s1728_s7 + $0x28] sm:$0xff] %vm741_vm0, %v907_v9 }
 0x26e   :  { %v1286_v13 = vpop.eup %1285  ;;  %930 = vst.msk [vmem:[%s1728_s7 + $0x60] sm:$0xff] %vm741_vm0, %v914_v11 }
 0x26f   :  { %v1288_v15 = vpop.eup %1287  ;;  %v915_v10 = vmul.f32 %v1286_v13, %v1629_v27 }
 0x270   :  { %v916_v16 = vmul.f32 %v1288_v15, %v1631_v28 }
 0x271   :  { %931 = vst.msk [vmem:[%s1728_s7 + $0x68] sm:$0xff] %vm741_vm0, %v915_v10 }
 0x272   :  { %v1290_v18 = vpop.eup %1289  ;;  %932 = vst.msk [vmem:[%s1728_s7 + $0x70] sm:$0xff] %vm741_vm0, %v916_v16 }
 0x273   :  { %v917_v19 = vmul.f32 %v1290_v18, %v1637_v32 }
 0x275   :  { %933 = vst.msk [vmem:[%s1728_s7 + $0x78] sm:$0xff] %vm741_vm0, %v917_v19 }

// kernel: gcn_attention_v3_forward.9
= control target key start
LH: loop header
LB: loop body
LE: loop exit
PB: predicated region body
PF: predicated region fallthrough
CT: control target
= control target key end

     0   :  { %vm247_vm0 = vcmask 64512   ;;  %s900_s1 = inlined_call_operand.vmem [shape: bf16[128,8], index: 1, kind: input, shape index: {}]   ;;  %s901_s0 = inlined_call_operand.vmem [shape: bf16[128,128], index: 0, kind: input, shape index: {}]   ;;  %s902_s2 = inlined_call_operand.vmem [shape: f32[1,8], index: 2, kind: input, shape index: {}]   ;;  %s903_s3 = inlined_call_operand.vmem [shape: f32[128,8], index: 3, kind: output, shape index: {}]  }
   0x1   :  { %v525_v0 = vld [vmem:[%s900_s1] sm:$0xff]   ;;  %v526_v1 = vld [vmem:[%s900_s1 + $0x8] sm:$0xff]   ;;  %v527_v2 = vld [vmem:[%s900_s1 + $0x10] sm:$0xff]  }
   0x2   :  { %477 = vmatprep.subr.bf16.mxu0 %v525_v0  ;;  %509 = vmatprep.subr.bf16.mxu1 %v525_v0  ;;  %v528_v3 = vld [vmem:[%s900_s1 + $0x18] sm:$0xff]   ;;  %v533_v4 = vld [vmem:[%s901_s0] sm:$0xff]   ;;  %v530_v7 = vld [vmem:[%s900_s1 + $0x28] sm:$0xff]  }
   0x3   :  { %478 = vmatpush3.bf16.msra.mxu0 %v525_v0  ;;  %517 = vmatpush3.bf16.msra.mxu1 %v525_v0  ;;  %v534_v5 = vld [vmem:[%s901_s0 + $0x20] sm:$0xff]   ;;  %v531_v8 = vld [vmem:[%s900_s1 + $0x30] sm:$0xff]   ;;  %v532_v9 = vld [vmem:[%s900_s1 + $0x38] sm:$0xff]  }
   0x4   :  { %479 = vmatprep.subr.bf16.mxu0 %v526_v1  ;;  %510 = vmatprep.subr.bf16.mxu1 %v526_v1  ;;  %v529_v6 = vld [vmem:[%s900_s1 + $0x20] sm:$0xff]   ;;  %v535_v10 = vld [vmem:[%s901_s0 + $0x8] sm:$0xff]   ;;  %v537_v12 = vld [vmem:[%s901_s0 + $0x10] sm:$0xff]  }
   0x5   :  { %493 = vmatprep.mubr.bf16.mxu0 %v533_v4  ;;  %501 = vmatprep.mubr.bf16.mxu1 %v534_v5  ;;  %v536_v11 = vld [vmem:[%s901_s0 + $0x28] sm:$0xff]   ;;  %v539_v13 = vld [vmem:[%s901_s0 + $0x30] sm:$0xff]   ;;  %v538_v14 = vld [vmem:[%s901_s0 + $0x18] sm:$0xff]  }
   0x6   :  { %v540_v15 = vld [vmem:[%s901_s0 + $0x38] sm:$0xff]   ;;  %v444_v16 = vld [vmem:[%s902_s2] ss:$0 sm:$0xff] }
   0x7   :  { %480 = vmatpush3.bf16.msra.mxu0 %v526_v1  ;;  %518 = vmatpush3.bf16.msra.mxu1 %v526_v1 }
   0x8   :  { %481 = vmatprep.subr.bf16.mxu0 %v527_v2  ;;  %511 = vmatprep.subr.bf16.mxu1 %v527_v2 }
   0xb   :  { %482 = vmatpush3.bf16.msra.mxu0 %v527_v2  ;;  %519 = vmatpush3.bf16.msra.mxu1 %v527_v2 }
   0xc   :  { %483 = vmatprep.subr.bf16.mxu0 %v528_v3  ;;  %512 = vmatprep.subr.bf16.mxu1 %v528_v3 }
   0xf   :  { %484 = vmatpush3.bf16.msra.mxu0 %v528_v3  ;;  %520 = vmatpush3.bf16.msra.mxu1 %v528_v3 }
  0x10   :  { %485 = vmatprep.subr.bf16.mxu0 %v529_v6  ;;  %513 = vmatprep.subr.bf16.mxu1 %v529_v6 }
  0x13   :  { %486 = vmatpush3.bf16.msra.mxu0 %v529_v6  ;;  %521 = vmatpush3.bf16.msra.mxu1 %v529_v6 }
  0x14   :  { %487 = vmatprep.subr.bf16.mxu0 %v530_v7  ;;  %514 = vmatprep.subr.bf16.mxu1 %v530_v7 }
  0x17   :  { %488 = vmatpush3.bf16.msra.mxu0 %v530_v7  ;;  %522 = vmatpush3.bf16.msra.mxu1 %v530_v7 }
  0x18   :  { %489 = vmatprep.subr.bf16.mxu0 %v531_v8  ;;  %515 = vmatprep.subr.bf16.mxu1 %v531_v8 }
  0x1b   :  { %490 = vmatpush3.bf16.msra.mxu0 %v531_v8  ;;  %523 = vmatpush3.bf16.msra.mxu1 %v531_v8 }
  0x1c   :  { %491 = vmatprep.subr.bf16.mxu0 %v532_v9  ;;  %516 = vmatprep.subr.bf16.mxu1 %v532_v9 }
  0x1f   :  { %492 = vmatpush3.bf16.msra.mxu0 %v532_v9  ;;  %524 = vmatpush3.bf16.msra.mxu1 %v532_v9 }
  0x22   :  { %494 = vmatmul.mubr.bf16.vlgmr.msra.gmra.mrb[0].mxu0 %v535_v10  ;;  %502 = vmatmul.mubr.bf16.vlgmr.msra.gmra.mrb[0].mxu1 %v536_v11 }
  0x23   :  { %497 = vmatprep.mubr.bf16.mxu0 %v537_v12  ;;  %505 = vmatprep.mubr.bf16.mxu1 %v539_v13 }
  0x2a   :  { %498 = vmatmul.mubr.bf16.gmra.mrb[4].mxu0 %v538_v14  ;;  %506 = vmatmul.mubr.bf16.gmra.mrb[4].mxu1 %v540_v15 }
  0xf5   :  { %v495_v17 = vpop.f32.mrb[0].mxu0  ;;  %v503_v18 = vpop.f32.mrb[0].mxu1 }
  0xf6   :  { %v676_v19 = vadd.f32 %v495_v17, %v444_v16  ;;  %v678_v20 = vadd.f32 %v503_v18, %v444_v16  ;;  %v184_v21 = vpop.f32.mrb[1].mxu0  ;;  %v216_v22 = vpop.f32.mrb[1].mxu1 }
  0xf7   :  { %v496_v23 = vpop.f32.mrb[2].mxu0  ;;  %v504_v24 = vpop.f32.mrb[2].mxu1  ;;  %v680_v25 = vadd.f32 %v444_v16, %v184_v21  ;;  %v688_v31 = vadd.f32 %v444_v16, %v216_v22 }
  0xf8   :  { %v682_v26 = vadd.f32 %v496_v23, %v444_v16  ;;  %v187_v27 = vpop.f32.mrb[3].mxu0  ;;  %v219_v28 = vpop.f32.mrb[3].mxu1  ;;  %v278_v29 = vsel %vm247_vm0, %v678_v20, -inf  ;;  %v254_v30 = vsel %vm247_vm0, %v676_v19, -inf  ;;  %v690_v32 = vadd.f32 %v504_v24, %v444_v16 }
  0xf9   :  { %279 = vmax.xlane.f32.xlu0 %v278_v29  ;;  %255 = vmax.xlane.f32.xlu1 %v254_v30  ;;  %v248_v34 = vsel %vm247_vm0, %v680_v25, -inf  ;;  %v696_v41 = vadd.f32 %v444_v16, %v187_v27  ;;  %v698_v42 = vadd.f32 %v444_v16, %v219_v28  ;;  %v272_v44 = vsel %vm247_vm0, %v688_v31, -inf }
  0xfa   :  { %v257_v33 = vsel %vm247_vm0, %v682_v26, -inf  ;;  %v281_v43 = vsel %vm247_vm0, %v690_v32, -inf }
  0xfb   :  { %v275_v49 = vsel %vm247_vm0, %v698_v42, -inf  ;;  %v251_v50 = vsel %vm247_vm0, %v696_v41, -inf }
  0xfd   :  { %258 = vmax.xlane.f32.xlu1 %v257_v33  ;;  %249 = vmax.xlane.f32.xlu0 %v248_v34  ;;  %v499_v35 = vpop.f32.mrb[4].mxu0  ;;  %v507_v36 = vpop.f32.mrb[4].mxu1 }
  0xfe   :  { %v200_v37 = vpop.f32.mrb[5].mxu0  ;;  %v232_v38 = vpop.f32.mrb[5].mxu1  ;;  %v704_v47 = vadd.f32 %v499_v35, %v444_v16  ;;  %v732_v61 = vadd.f32 %v507_v36, %v444_v16 }
  0xff   :  { %v500_v39 = vpop.f32.mrb[6].mxu0  ;;  %v508_v40 = vpop.f32.mrb[6].mxu1  ;;  %v716_v53 = vadd.f32 %v444_v16, %v200_v37  ;;  %v720_v55 = vadd.f32 %v444_v16, %v232_v38 }
 0x100   :  { %v203_v45 = vpop.f32.mrb[7].mxu0  ;;  %v235_v46 = vpop.f32.mrb[7].mxu1  ;;  %v706_v48 = vadd.f32 %v500_v39, %v444_v16  ;;  %v266_v52 = vsel %vm247_vm0, %v704_v47, -inf  ;;  %v734_v62 = vadd.f32 %v508_v40, %v444_v16  ;;  %v290_v0 = vsel %vm247_vm0, %v732_v61, -inf }
 0x101   :  { %282 = vmax.xlane.f32.xlu1 %v281_v43  ;;  %273 = vmax.xlane.f32.xlu0 %v272_v44  ;;  %v718_v54 = vadd.f32 %v444_v16, %v203_v45  ;;  %v722_v56 = vadd.f32 %v444_v16, %v235_v46  ;;  %v260_v58 = vsel %vm247_vm0, %v716_v53, -inf  ;;  %v284_v60 = vsel %vm247_vm0, %v720_v55, -inf }
 0x102   :  { %v269_v51 = vsel %vm247_vm0, %v706_v48, -inf  ;;  %v293_v63 = vsel %vm247_vm0, %v734_v62, -inf }
 0x103   :  { %v263_v57 = vsel %vm247_vm0, %v718_v54, -inf  ;;  %v287_v59 = vsel %vm247_vm0, %v722_v56, -inf }
 0x105   :  { %276 = vmax.xlane.f32.xlu1 %v275_v49  ;;  %252 = vmax.xlane.f32.xlu0 %v251_v50 }
 0x109   :  { %270 = vmax.xlane.f32.xlu1 %v269_v51  ;;  %267 = vmax.xlane.f32.xlu0 %v266_v52 }
 0x10d   :  { %264 = vmax.xlane.f32.xlu1 %v263_v57  ;;  %261 = vmax.xlane.f32.xlu0 %v260_v58 }
 0x111   :  { %288 = vmax.xlane.f32.xlu1 %v287_v59  ;;  %285 = vmax.xlane.f32.xlu0 %v284_v60 }
 0x115   :  { %294 = vmax.xlane.f32.xlu1 %v293_v63  ;;  %291 = vmax.xlane.f32.xlu0 %v290_v0 }
 0x186   :  { %v280_v1 = vpop.xlane.xlu0 %279  ;;  %v256_v2 = vpop.xlane.xlu1 %255 }
 0x187   :  { %v306_v3 = vsub.f32 %v678_v20, %v280_v1  ;;  %v298_v4 = vsub.f32 %v676_v19, %v256_v2 }
 0x189   :  { %v316_v5 = vmul.f32 1.442695, %v298_v4  ;;  %v332_v6 = vmul.f32 1.442695, %v306_v3 }
 0x18a   :  { %v259_v7 = vpop.xlane.xlu1 %258  ;;  %v250_v8 = vpop.xlane.xlu0 %249 }
 0x18b   :  { %v299_v9 = vsub.f32 %v682_v26, %v259_v7  ;;  %v296_v10 = vsub.f32 %v680_v25, %v250_v8  ;;  %541 = vpow2.f32 %v316_v5 }
 0x18c   :  { %543 = vpow2.f32 %v332_v6 }
 0x18d   :  { %v318_v11 = vmul.f32 1.442695, %v299_v9  ;;  %v312_v12 = vmul.f32 1.442695, %v296_v10 }
 0x18e   :  { %v283_v13 = vpop.xlane.xlu1 %282  ;;  %v274_v14 = vpop.xlane.xlu0 %273 }
 0x18f   :  { %545 = vpow2.f32 %v318_v11  ;;  %v307_v15 = vsub.f32 %v690_v32, %v283_v13  ;;  %v304_v16 = vsub.f32 %v688_v31, %v274_v14 }
 0x190   :  { %547 = vpow2.f32 %v312_v12 }
 0x191   :  { %v334_v17 = vmul.f32 1.442695, %v307_v15  ;;  %v328_v18 = vmul.f32 1.442695, %v304_v16 }
 0x192   :  { %v277_v19 = vpop.xlane.xlu1 %276  ;;  %v253_v20 = vpop.xlane.xlu0 %252 }
 0x193   :  { %549 = vpow2.f32 %v334_v17  ;;  %v305_v21 = vsub.f32 %v698_v42, %v277_v19  ;;  %v297_v22 = vsub.f32 %v696_v41, %v253_v20 }
 0x194   :  { %551 = vpow2.f32 %v328_v18 }
 0x195   :  { %v314_v23 = vmul.f32 1.442695, %v297_v22  ;;  %v748_v24 = vpop.eup %541  ;;  %v330_v25 = vmul.f32 1.442695, %v305_v21 }
 0x196   :  { %v271_v26 = vpop.xlane.xlu1 %270  ;;  %v268_v27 = vpop.xlane.xlu0 %267  ;;  %v350_v30 = vsel %vm247_vm0, %v748_v24, 0.0 }
 0x197   :  { %v303_v28 = vsub.f32 %v706_v48, %v271_v26  ;;  %v302_v29 = vsub.f32 %v704_v47, %v268_v27  ;;  %v754_v31 = vpop.eup %543  ;;  %553 = vpow2.f32 %v314_v23  ;;  %351 = vadd.xlane.f32.xlu0 %v350_v30 }
 0x198   :  { %555 = vpow2.f32 %v330_v25  ;;  %v374_v40 = vsel %vm247_vm0, %v754_v31, 0.0 }
 0x199   :  { %v756_v32 = vpop.eup %545  ;;  %v324_v33 = vmul.f32 1.442695, %v302_v29  ;;  %v326_v34 = vmul.f32 1.442695, %v303_v28 }
 0x19a   :  { %v265_v35 = vpop.xlane.xlu1 %264  ;;  %v262_v36 = vpop.xlane.xlu0 %261  ;;  %v353_v37 = vsel %vm247_vm0, %v756_v32, 0.0 }
 0x19b   :  { %v301_v38 = vsub.f32 %v718_v54, %v265_v35  ;;  %v300_v39 = vsub.f32 %v716_v53, %v262_v36  ;;  %354 = vadd.xlane.f32.xlu1 %v353_v37  ;;  %v764_v41 = vpop.eup %547  ;;  %557 = vpow2.f32 %v324_v33  ;;  %375 = vadd.xlane.f32.xlu0 %v374_v40 }
 0x19c   :  { %559 = vpow2.f32 %v326_v34  ;;  %v344_v50 = vsel %vm247_vm0, %v764_v41, 0.0 }
 0x19d   :  { %v766_v42 = vpop.eup %549  ;;  %v320_v43 = vmul.f32 1.442695, %v300_v39  ;;  %v322_v44 = vmul.f32 1.442695, %v301_v38 }
 0x19e   :  { %v289_v45 = vpop.xlane.xlu1 %288  ;;  %v286_v46 = vpop.xlane.xlu0 %285  ;;  %v377_v47 = vsel %vm247_vm0, %v766_v42, 0.0 }
 0x19f   :  { %v309_v48 = vsub.f32 %v722_v56, %v289_v45  ;;  %v308_v49 = vsub.f32 %v720_v55, %v286_v46  ;;  %378 = vadd.xlane.f32.xlu1 %v377_v47  ;;  %v774_v51 = vpop.eup %551  ;;  %561 = vpow2.f32 %v320_v43  ;;  %345 = vadd.xlane.f32.xlu0 %v344_v50 }
 0x1a0   :  { %563 = vpow2.f32 %v322_v44  ;;  %v368_v55 = vsel %vm247_vm0, %v774_v51, 0.0 }
 0x1a1   :  { %v336_v52 = vmul.f32 1.442695, %v308_v49  ;;  %v776_v53 = vpop.eup %553  ;;  %v338_v54 = vmul.f32 1.442695, %v309_v48 }
 0x1a2   :  { %v295_v57 = vpop.xlane.xlu1 %294  ;;  %v292_v58 = vpop.xlane.xlu0 %291  ;;  %v347_v60 = vsel %vm247_vm0, %v776_v53, 0.0 }
 0x1a3   :  { %v311_v59 = vsub.f32 %v734_v62, %v295_v57  ;;  %v310_v56 = vsub.f32 %v732_v61, %v292_v58  ;;  %v784_v63 = vpop.eup %555  ;;  %565 = vpow2.f32 %v336_v52  ;;  %369 = vadd.xlane.f32.xlu0 %v368_v55  ;;  %348 = vadd.xlane.f32.xlu1 %v347_v60 }
 0x1a4   :  { %567 = vpow2.f32 %v338_v54  ;;  %v371_v62 = vsel %vm247_vm0, %v784_v63, 0.0 }
 0x1a5   :  { %v340_v0 = vmul.f32 1.442695, %v310_v56  ;;  %v786_v1 = vpop.eup %557  ;;  %v342_v2 = vmul.f32 1.442695, %v311_v59 }
 0x1a6   :  { %v362_v61 = vsel %vm247_vm0, %v786_v1, 0.0  ;;  %v792_v3 = vpop.eup %559 }
 0x1a7   :  { %569 = vpow2.f32 %v340_v0  ;;  %372 = vadd.xlane.f32.xlu1 %v371_v62  ;;  %363 = vadd.xlane.f32.xlu0 %v362_v61  ;;  %v365_v5 = vsel %vm247_vm0, %v792_v3, 0.0 }
 0x1a8   :  { %571 = vpow2.f32 %v342_v2 }
 0x1a9   :  { %v794_v4 = vpop.eup %561 }
 0x1aa   :  { %v356_v6 = vsel %vm247_vm0, %v794_v4, 0.0  ;;  %v800_v7 = vpop.eup %563 }
 0x1ab   :  { %366 = vadd.xlane.f32.xlu1 %v365_v5  ;;  %357 = vadd.xlane.f32.xlu0 %v356_v6  ;;  %v359_v9 = vsel %vm247_vm0, %v800_v7, 0.0 }
 0x1ad   :  { %v802_v8 = vpop.eup %565 }
 0x1ae   :  { %v380_v10 = vsel %vm247_vm0, %v802_v8, 0.0  ;;  %v808_v11 = vpop.eup %567 }
 0x1af   :  { %360 = vadd.xlane.f32.xlu1 %v359_v9  ;;  %381 = vadd.xlane.f32.xlu0 %v380_v10  ;;  %v383_v13 = vsel %vm247_vm0, %v808_v11, 0.0 }
 0x1b1   :  { %v810_v12 = vpop.eup %569 }
 0x1b2   :  { %v386_v14 = vsel %vm247_vm0, %v810_v12, 0.0  ;;  %v816_v15 = vpop.eup %571 }
 0x1b3   :  { %384 = vadd.xlane.f32.xlu1 %v383_v13  ;;  %387 = vadd.xlane.f32.xlu0 %v386_v14  ;;  %v389_v16 = vsel %vm247_vm0, %v816_v15, 0.0 }
 0x1b7   :  { %390 = vadd.xlane.f32.xlu1 %v389_v16 }
 0x224   :  { %v352_v17 = vpop.xlane.xlu0 %351 }
 0x225   :  { %573 = vrcp.f32 %v352_v17 }
 0x228   :  { %v355_v18 = vpop.xlane.xlu1 %354  ;;  %v376_v19 = vpop.xlane.xlu0 %375 }
 0x229   :  { %575 = vrcp.f32 %v355_v18 }
 0x22a   :  { %577 = vrcp.f32 %v376_v19 }
 0x22c   :  { %v379_v20 = vpop.xlane.xlu1 %378  ;;  %v346_v21 = vpop.xlane.xlu0 %345 }
 0x22d   :  { %579 = vrcp.f32 %v379_v20 }
 0x22e   :  { %581 = vrcp.f32 %v346_v21 }
 0x22f   :  { %v574_v22 = vpop.eup %573 }
 0x230   :  { %v410_v23 = vmul.f32 %v574_v22, %v748_v24  ;;  %v349_v25 = vpop.xlane.xlu1 %348  ;;  %v370_v26 = vpop.xlane.xlu0 %369 }
 0x231   :  { %583 = vrcp.f32 %v349_v25 }
 0x232   :  { %426 = vst.msk [vmem:[%s903_s3 + $0x10] sm:$0xff] %vm247_vm0, %v410_v23  ;;  %585 = vrcp.f32 %v370_v26 }
 0x233   :  { %v576_v27 = vpop.eup %575 }
 0x234   :  { %v578_v28 = vpop.eup %577  ;;  %v411_v29 = vmul.f32 %v576_v27, %v756_v32  ;;  %v373_v33 = vpop.xlane.xlu1 %372 }
 0x235   :  { %v418_v30 = vmul.f32 %v578_v28, %v754_v31  ;;  %v364_v34 = vpop.xlane.xlu0 %363  ;;  %587 = vrcp.f32 %v373_v33 }
 0x236   :  { %427 = vst.msk [vmem:[%s903_s3 + $0x18] sm:$0xff] %vm247_vm0, %v411_v29  ;;  %589 = vrcp.f32 %v364_v34 }
 0x237   :  { %v580_v24 = vpop.eup %579  ;;  %434 = vst.msk [vmem:[%s903_s3 + $0x50] sm:$0xff] %vm247_vm0, %v418_v30 }
 0x238   :  { %v582_v35 = vpop.eup %581  ;;  %v419_v32 = vmul.f32 %v580_v24, %v766_v42  ;;  %v367_v36 = vpop.xlane.xlu1 %366 }
 0x239   :  { %v408_v31 = vmul.f32 %v582_v35, %v764_v41  ;;  %v358_v37 = vpop.xlane.xlu0 %357  ;;  %591 = vrcp.f32 %v367_v36 }
 0x23a   :  { %435 = vst.msk [vmem:[%s903_s3 + $0x58] sm:$0xff] %vm247_vm0, %v419_v32  ;;  %593 = vrcp.f32 %v358_v37 }
 0x23b   :  { %424 = vst.msk [vmem:[%s903_s3] sm:$0xff] %vm247_vm0, %v408_v31  ;;  %v584_v38 = vpop.eup %583 }
 0x23c   :  { %v586_v39 = vpop.eup %585  ;;  %v409_v40 = vmul.f32 %v584_v38, %v776_v53  ;;  %v361_v42 = vpop.xlane.xlu1 %360 }
 0x23d   :  { %v382_v41 = vpop.xlane.xlu0 %381  ;;  %v416_v43 = vmul.f32 %v586_v39, %v774_v51  ;;  %595 = vrcp.f32 %v361_v42 }
 0x23e   :  { %425 = vst.msk [vmem:[%s903_s3 + $0x8] sm:$0xff] %vm247_vm0, %v409_v40  ;;  %597 = vrcp.f32 %v382_v41 }
 0x23f   :  { %v588_v44 = vpop.eup %587  ;;  %432 = vst.msk [vmem:[%s903_s3 + $0x40] sm:$0xff] %vm247_vm0, %v416_v43 }
 0x240   :  { %v590_v45 = vpop.eup %589  ;;  %v417_v46 = vmul.f32 %v588_v44, %v784_v63  ;;  %v385_v47 = vpop.xlane.xlu1 %384 }
 0x241   :  { %v388_v48 = vpop.xlane.xlu0 %387  ;;  %v414_v49 = vmul.f32 %v590_v45, %v786_v1  ;;  %599 = vrcp.f32 %v385_v47 }
 0x242   :  { %433 = vst.msk [vmem:[%s903_s3 + $0x48] sm:$0xff] %vm247_vm0, %v417_v46  ;;  %601 = vrcp.f32 %v388_v48 }
 0x243   :  { %v592_v50 = vpop.eup %591  ;;  %430 = vst.msk [vmem:[%s903_s3 + $0x30] sm:$0xff] %vm247_vm0, %v414_v49 }
 0x244   :  { %v594_v51 = vpop.eup %593  ;;  %v415_v52 = vmul.f32 %v592_v50, %v792_v3  ;;  %v391_v53 = vpop.xlane.xlu1 %390 }
 0x245   :  { %v412_v54 = vmul.f32 %v594_v51, %v794_v4  ;;  %603 = vrcp.f32 %v391_v53 }
 0x246   :  { %431 = vst.msk [vmem:[%s903_s3 + $0x38] sm:$0xff] %vm247_vm0, %v415_v52 }
 0x247   :  { %v596_v57 = vpop.eup %595  ;;  %428 = vst.msk [vmem:[%s903_s3 + $0x20] sm:$0xff] %vm247_vm0, %v412_v54 }
 0x248   :  { %v598_v58 = vpop.eup %597  ;;  %v413_v59 = vmul.f32 %v596_v57, %v800_v7 }
 0x249   :  { %v420_v56 = vmul.f32 %v598_v58, %v802_v8 }
 0x24a   :  { %429 = vst.msk [vmem:[%s903_s3 + $0x28] sm:$0xff] %vm247_vm0, %v413_v59 }
 0x24b   :  { %v600_v55 = vpop.eup %599  ;;  %436 = vst.msk [vmem:[%s903_s3 + $0x60] sm:$0xff] %vm247_vm0, %v420_v56 }
 0x24c   :  { %v602_v60 = vpop.eup %601  ;;  %v421_v63 = vmul.f32 %v600_v55, %v808_v11 }
 0x24d   :  { %v422_v0 = vmul.f32 %v602_v60, %v810_v12 }
 0x24e   :  { %437 = vst.msk [vmem:[%s903_s3 + $0x68] sm:$0xff] %vm247_vm0, %v421_v63 }
 0x24f   :  { %v604_v1 = vpop.eup %603  ;;  %438 = vst.msk [vmem:[%s903_s3 + $0x70] sm:$0xff] %vm247_vm0, %v422_v0 }
 0x250   :  { %v423_v2 = vmul.f32 %v604_v1, %v816_v15 }
 0x252   :  { %439 = vst.msk [vmem:[%s903_s3 + $0x78] sm:$0xff] %vm247_vm0, %v423_v2 }

</bundles_post_ra>
